<compile_context>
chip_gen: v7x
topology: tpu7x:2x2x1
jax: 0.10.0
libtpu: 0.0.40
codegen_flags: <defaults>
</compile_context>

<pallas_src>
import math

import jax
import jax.numpy as jnp
import numpy as np
from jax import lax
from jax.experimental import pallas as pl
from jax.experimental.pallas import tpu as pltpu


_NUM_GATES = {"LSTM": 4, "GRU": 3, "RNN": 1}


def _round_up(x, m):
    return ((x + m - 1) // m) * m


# ----------------------------- Pallas kernels ------------------------------ #
# All kernels consume a pre-computed input projection gx (Tc, tb, G*Hp) and the resident
# recurrent weight W_hh^T (Hp, G*Hp); hidden (and cell) state persists in VMEM scratch
# across the sequential time-block grid axis (axis 1), and is carried in registers inside
# the unrolled per-timestep loop.

def _lstm_block_kernel(gx_ref, whh_ref, y_ref, h_ref, c_ref):
    Tc = gx_ref.shape[0]
    Hp = h_ref.shape[1]

    @pl.when(pl.program_id(1) == 0)
    def _():
        h_ref[...] = jnp.zeros_like(h_ref)
        c_ref[...] = jnp.zeros_like(c_ref)

    whh = whh_ref[...]                              # hoisted: loaded once per time-block

    def step(j, carry):
        h, c = carry
        gates = gx_ref[j] + jnp.dot(h.astype(whh.dtype), whh,
                                    preferred_element_type=jnp.float32)     # (tb, 4*Hp)
        i = jax.nn.sigmoid(gates[:, 0 * Hp:1 * Hp])
        f = jax.nn.sigmoid(gates[:, 1 * Hp:2 * Hp])
        g = jnp.tanh(gates[:, 2 * Hp:3 * Hp])
        o = jax.nn.sigmoid(gates[:, 3 * Hp:4 * Hp])
        c_new = f * c + i * g
        h_new = o * jnp.tanh(c_new)
        y_ref[j] = h_new.astype(y_ref.dtype)
        return (h_new, c_new)

    h_fin, c_fin = lax.fori_loop(0, Tc, step, (h_ref[...], c_ref[...]), unroll=True)
    h_ref[...] = h_fin
    c_ref[...] = c_fin


def _gru_block_kernel(gx_ref, whh_ref, bhh_ref, y_ref, h_ref):
    Tc = gx_ref.shape[0]
    Hp = h_ref.shape[1]

    @pl.when(pl.program_id(1) == 0)
    def _():
        h_ref[...] = jnp.zeros_like(h_ref)

    whh = whh_ref[...]                              # hoisted weight load
    bhh = bhh_ref[...]                              # hoisted h-path bias (b_hr, b_hz, b_hn)

    def step(j, h):
        gh = jnp.dot(h.astype(whh.dtype), whh,
                     preferred_element_type=jnp.float32) + bhh              # (tb, 3*Hp)
        gxj = gx_ref[j]                                                     # b_ih already folded in
        r = jax.nn.sigmoid(gxj[:, 0 * Hp:1 * Hp] + gh[:, 0 * Hp:1 * Hp])
        z = jax.nn.sigmoid(gxj[:, 1 * Hp:2 * Hp] + gh[:, 1 * Hp:2 * Hp])
        n = jnp.tanh(gxj[:, 2 * Hp:3 * Hp] + r * gh[:, 2 * Hp:3 * Hp])      # b_hn inside r-product
        h_new = (1.0 - z) * n + z * h
        y_ref[j] = h_new.astype(y_ref.dtype)
        return h_new

    h_fin = lax.fori_loop(0, Tc, step, h_ref[...], unroll=True)
    h_ref[...] = h_fin


def _rnn_tanh_block_kernel(gx_ref, whh_ref, y_ref, h_ref):
    Tc = gx_ref.shape[0]

    @pl.when(pl.program_id(1) == 0)
    def _():
        h_ref[...] = jnp.zeros_like(h_ref)

    whh = whh_ref[...]                              # hoisted weight load

    def step(j, h):
        h_new = jnp.tanh(gx_ref[j] + jnp.dot(h.astype(whh.dtype), whh,
                                             preferred_element_type=jnp.float32))
        y_ref[j] = h_new.astype(y_ref.dtype)
        return h_new

    h_fin = lax.fori_loop(0, Tc, step, h_ref[...], unroll=True)
    h_ref[...] = h_fin


_KERNELS = {"LSTM": _lstm_block_kernel, "GRU": _gru_block_kernel, "RNN": _rnn_tanh_block_kernel}


# ------------------------------ layer wrapper ------------------------------ #

def _run_layer(mode, layer_in, layout, w_ih, w_hh, b_ih, b_hh, *, Hp, Tc, use_bf16):
    """One recurrent layer.

    layer_in: padded activations; (Bp, Tp, I) if layout == 'bti', else (Tp, Bp, I) time-major.
    Returns y: (Tp, Bp, Hp) time-major, f32, padded hidden dims are exact zeros.
    """
    G = _NUM_GATES[mode]
    H = w_hh.shape[1]
    Iw = w_ih.shape[1]
    if layout == "bti":
        Bp, Tp, Ip = layer_in.shape
    else:
        Tp, Bp, Ip = layer_in.shape
    GHp = G * Hp

    # Per-gate zero padding: H -> Hp on gate/output dims, Iw -> Ip on input dim.
    w_ih_p = jnp.pad(jnp.asarray(w_ih, jnp.float32).reshape(G, H, Iw),
                     ((0, 0), (0, Hp - H), (0, Ip - Iw)))
    wih_t = jnp.transpose(w_ih_p, (2, 0, 1)).reshape(Ip, GHp)               # (Ip, G*Hp)
    w_hh_p = jnp.pad(jnp.asarray(w_hh, jnp.float32).reshape(G, H, H),
                     ((0, 0), (0, Hp - H), (0, Hp - H)))
    whh_t = jnp.transpose(w_hh_p, (2, 0, 1)).reshape(Hp, GHp)               # (Hp, G*Hp)
    b_ih_p = jnp.pad(jnp.asarray(b_ih, jnp.float32).reshape(G, H), ((0, 0), (0, Hp - H))).reshape(GHp)
    b_hh_p = jnp.pad(jnp.asarray(b_hh, jnp.float32).reshape(G, H), ((0, 0), (0, Hp - H))).reshape(GHp)

    # Hoisted input projection: one big matmul over all timesteps (transpose fused via einsum).
    bias_x = b_ih_p if mode == "GRU" else b_ih_p + b_hh_p   # GRU: b_hn must stay on the h path
    eq = "bti,ig->tbg" if layout == "bti" else "tbi,ig->tbg"
    prec = lax.Precision.DEFAULT if use_bf16 else lax.Precision.HIGHEST
    gx = jnp.einsum(eq, layer_in.astype(jnp.float32), wih_t, precision=prec) + bias_x  # (Tp, Bp, GHp)

    if use_bf16:
        whh_t = whh_t.astype(jnp.bfloat16)   # bf16 MXU operands, f32 accumulation in-kernel

    # Grid: batch blocks (parallel, feeds v7x's 2 TCs) x time blocks (sequential recurrence).
    n_bb = 2 if (Bp >= 16 and Bp % 16 == 0) else 1
    tb = Bp // n_bb
    n_tb = Tp // Tc

    in_specs = [
        pl.BlockSpec((Tc, tb, GHp), lambda bb, tt: (tt, bb, 0)),   # gx block (streamed)
        pl.BlockSpec((Hp, GHp), lambda bb, tt: (0, 0)),            # W_hh^T (grid-invariant, resident)
    ]
    inputs = [gx, whh_t]
    if mode == "GRU":
        in_specs.append(pl.BlockSpec((1, GHp), lambda bb, tt: (0, 0)))   # b_hh (needed on h path)
        inputs.append(b_hh_p.reshape(1, GHp))

    scratch = [pltpu.VMEM((tb, Hp), jnp.float32)]                  # hidden state
    if mode == "LSTM":
        scratch.append(pltpu.VMEM((tb, Hp), jnp.float32))          # cell state

    y = pl.pallas_call(
        _KERNELS[mode],
        out_shape=jax.ShapeDtypeStruct((Tp, Bp, Hp), jnp.float32),
        grid_spec=pltpu.PrefetchScalarGridSpec(
            num_scalar_prefetch=0,
            grid=(n_bb, n_tb),
            in_specs=in_specs,
            out_specs=pl.BlockSpec((Tc, tb, Hp), lambda bb, tt: (tt, bb, 0)),
            scratch_shapes=scratch,
        ),
        compiler_params=pltpu.CompilerParams(
            dimension_semantics=("parallel", "arbitrary"),
            vmem_limit_bytes=48 * 1024 * 1024,   # explicit budget; safe headroom on v7x's 64 MiB
        ),
    )(*inputs)
    return y


def rnn_layers_forward(mode, x_bti, params, *, use_bf16=True, tc=8):
    """Equivalent of RNNLayers.forward(inputs, hx=None) with batch_first=True.

    x_bti: (B, T, input_size);  returns (B, T, hidden_size) in float32.
    params: list of (w_ih, w_hh, b_ih, b_hh) per layer (PyTorch layout / gate order).
    """
    B, T, _ = x_bti.shape
    H = params[0][1].shape[1]
    Bp = _round_up(max(B, 8), 8)                 # lane/sublane-friendly batch
    Hp = _round_up(max(H, 128), 128)             # lane-dense hidden (gate slices aligned)
    Tc = max(1, min(int(tc), T))                 # timesteps per grid step
    Tp = _round_up(T, Tc)

    # Zero-pad batch and time once; padded rows/steps never contaminate valid outputs
    # (time padding only at the END of the sequence).
    x = jnp.pad(x_bti.astype(jnp.float32), ((0, Bp - B), (0, Tp - T), (0, 0)))

    layer_in, layout = x, "bti"                  # layer 0 consumes batch-first directly (einsum fuses the transpose)
    for (w_ih, w_hh, b_ih, b_hh) in params:
        layer_in = _run_layer(mode, layer_in, layout, w_ih, w_hh, b_ih, b_hh,
                              Hp=Hp, Tc=Tc, use_bf16=use_bf16)
        layout = "tbg"                           # later layers stay time-major (no per-layer transpose)

    y = jnp.transpose(layer_in, (1, 0, 2))       # single exit transpose -> (Bp, Tp, Hp)
    return y[:B, :T, :H]


# --------------------------- parameter init (PyTorch-style) ----------------- #

def init_params(key, mode, input_size, hidden_size, num_layers):
    G = _NUM_GATES[mode]
    k = 1.0 / math.sqrt(hidden_size)
    params = []
    in_sz = input_size
    for _ in range(num_layers):
        key, k1, k2, k3, k4 = jax.random.split(key, 5)
        w_ih = jax.random.uniform(k1, (G * hidden_size, in_sz), jnp.float32, -k, k)
        w_hh = jax.random.uniform(k2, (G * hidden_size, hidden_size), jnp.float32, -k, k)
        b_ih = jax.random.uniform(k3, (G * hidden_size,), jnp.float32, -k, k)
        b_hh = jax.random.uniform(k4, (G * hidden_size,), jnp.float32, -k, k)
        params.append((w_ih, w_hh, b_ih, b_hh))
        in_sz = hidden_size
    return params


# ------------------------------ pure-JAX reference -------------------------- #

def _ref_layer(mode, x_tbi, w_ih, w_hh, b_ih, b_hh):
    H = w_hh.shape[1]
    B = x_tbi.shape[1]
    hp = lax.Precision.HIGHEST

    def step(carry, x):
        if mode == "LSTM":
            h, c = carry
            gates = (jnp.dot(x, w_ih.T, precision=hp) + b_ih
                     + jnp.dot(h, w_hh.T, precision=hp) + b_hh)
            i, f, g, o = jnp.split(gates, 4, axis=-1)
            c = jax.nn.sigmoid(f) * c + jax.nn.sigmoid(i) * jnp.tanh(g)
            h = jax.nn.sigmoid(o) * jnp.tanh(c)
            return (h, c), h
        if mode == "GRU":
            h = carry
            gx = jnp.dot(x, w_ih.T, precision=hp) + b_ih
            gh = jnp.dot(h, w_hh.T, precision=hp) + b_hh
            r = jax.nn.sigmoid(gx[:, :H] + gh[:, :H])
            z = jax.nn.sigmoid(gx[:, H:2 * H] + gh[:, H:2 * H])
            n = jnp.tanh(gx[:, 2 * H:] + r * gh[:, 2 * H:])
            h = (1.0 - z) * n + z * h
            return h, h
        h = carry
        h = jnp.tanh(jnp.dot(x, w_ih.T, precision=hp) + b_ih
                     + jnp.dot(h, w_hh.T, precision=hp) + b_hh)
        return h, h

    init = ((jnp.zeros((B, H)), jnp.zeros((B, H))) if mode == "LSTM" else jnp.zeros((B, H)))
    _, ys = lax.scan(step, init, x_tbi)
    return ys


def ref_forward(mode, x_bti, params):
    x = jnp.transpose(x_bti, (1, 0, 2))
    for (w_ih, w_hh, b_ih, b_hh) in params:
        x = _ref_layer(mode, x, w_ih, w_hh, b_ih, b_hh)
    return jnp.transpose(x, (1, 0, 2))


# ---------------------------------- main ------------------------------------ #

if __name__ == "__main__":
    B, T, I, H, L = 2, 8, 16, 32, 2

    key = jax.random.PRNGKey(0)
    key, kx = jax.random.split(key)
    x = jax.random.normal(kx, (B, T, I), jnp.float32)

    for idx, mode in enumerate(("LSTM", "GRU", "RNN")):
        params = init_params(jax.random.PRNGKey(idx + 1), mode, I, H, L)
        ref = jax.block_until_ready(ref_forward(mode, x, params))

        # f32 resident-weight path (tight tolerance).
        out_f32 = jax.block_until_ready(rnn_layers_forward(mode, x, params, use_bf16=False))
        assert out_f32.shape == (B, T, H), (mode, out_f32.shape)
        np.testing.assert_allclose(np.asarray(out_f32), np.asarray(ref), atol=2e-4, rtol=2e-4)

        # bf16 MXU-operand path (f32 accumulation; loose tolerance for bf16 drift).
        out_bf16 = jax.block_until_ready(rnn_layers_forward(mode, x, params, use_bf16=True))
        assert out_bf16.shape == (B, T, H), (mode, out_bf16.shape)
        np.testing.assert_allclose(np.asarray(out_bf16), np.asarray(ref), atol=5e-2, rtol=5e-2)

    print("KERNEL_OK")
</pallas_src>

<mosaic_0001>
module attributes {stable_mosaic.version = 11 : i64} {
  func.func @_lstm_block_kernel(%arg0: i32, %arg1: i32, %arg2: memref<8x8x512xf32, #tpu.memory_space<vmem>>, %arg3: memref<128x512xf32, #tpu.memory_space<vmem>>, %arg4: memref<8x8x128xf32, #tpu.memory_space<vmem>>, %arg5: memref<8x128xf32, #tpu.memory_space<vmem>>, %arg6: memref<8x128xf32, #tpu.memory_space<vmem>>) attributes {dimension_semantics = [#tpu.dimension_semantics<parallel>, #tpu.dimension_semantics<arbitrary>], iteration_bounds = array<i64: 1, 1>, scalar_prefetch = 0 : i64, scratch_operands = 2 : i64, tpu.core_type = #tpu.core_type<tc>, window_params = [{transform_indices = @transform_0, window_bounds = array<i64: 8, 8, 512>}, {pipeline_mode = #tpu.pipeline_mode<synchronous>, transform_indices = @transform_1, window_bounds = array<i64: 128, 512>}, {transform_indices = @transform_2, window_bounds = array<i64: 8, 8, 128>}]} {
    %c0_i32 = arith.constant 0 : i32
    %0 = arith.cmpi eq, %arg1, %c0_i32 : i32
    %1 = arith.extui %0 : i1 to i32
    %c0_i32_0 = arith.constant 0 : i32
    %2 = arith.cmpi ne, %1, %c0_i32_0 : i32
    scf.if %2 {
      %cst_74 = arith.constant 0.000000e+00 : f32
      %280 = vector.broadcast %cst_74 : f32 to vector<8x128xf32>
      %c0_75 = arith.constant 0 : index
      %c0_76 = arith.constant 0 : index
      %281 = vector.load %arg5[%c0_75, %c0_76] : memref<8x128xf32, #tpu.memory_space<vmem>>, vector<8x128xf32>
      tpu.vector_store %arg5[%c0_75, %c0_76], %280 {strides = array<i32>} : memref<8x128xf32, #tpu.memory_space<vmem>>, vector<8x128xf32>,
      %cst_77 = arith.constant 0.000000e+00 : f32
      %282 = vector.broadcast %cst_77 : f32 to vector<8x128xf32>
      %c0_78 = arith.constant 0 : index
      %c0_79 = arith.constant 0 : index
      %283 = vector.load %arg6[%c0_78, %c0_79] : memref<8x128xf32, #tpu.memory_space<vmem>>, vector<8x128xf32>
      tpu.vector_store %arg6[%c0_78, %c0_79], %282 {strides = array<i32>} : memref<8x128xf32, #tpu.memory_space<vmem>>, vector<8x128xf32>,
    } else {
    }
    %c0 = arith.constant 0 : index
    %c0_1 = arith.constant 0 : index
    %3 = vector.load %arg3[%c0, %c0_1] : memref<128x512xf32, #tpu.memory_space<vmem>>, vector<128x512xf32>
    %c0_2 = arith.constant 0 : index
    %c0_3 = arith.constant 0 : index
    %4 = vector.load %arg5[%c0_2, %c0_3] : memref<8x128xf32, #tpu.memory_space<vmem>>, vector<8x128xf32>
    %c0_4 = arith.constant 0 : index
    %c0_5 = arith.constant 0 : index
    %5 = vector.load %arg6[%c0_4, %c0_5] : memref<8x128xf32, #tpu.memory_space<vmem>>, vector<8x128xf32>
    %c0_i32_6 = arith.constant 0 : i32
    %6 = arith.index_cast %c0_i32_6 : i32 to index
    %c0_7 = arith.constant 0 : index
    %c0_8 = arith.constant 0 : index
    %7 = vector.load %arg2[%6, %c0_7, %c0_8] : memref<8x8x512xf32, #tpu.memory_space<vmem>>, vector<1x8x512xf32>
    %8 = vector.shape_cast %7 : vector<1x8x512xf32> to vector<8x512xf32>
    %cst = arith.constant dense<0.000000e+00> : vector<8x512xf32>
    %9 = tpu.matmul %4, %3, %cst {dimension_numbers = #tpu.dot_dimension_numbers<[1], [0], [0], [1], [0, 0, 1, 1], [], []>} : vector<8x128xf32>, vector<128x512xf32>, vector<8x512xf32> -> vector<8x512xf32>
    %10 = arith.addf %8, %9 : vector<8x512xf32>
    %11 = vector.extract_strided_slice %10 {offsets = [0, 0], sizes = [8, 128], strides = [1, 1]} : vector<8x512xf32> to vector<8x128xf32>
    %12 = arith.negf %11 : vector<8x128xf32>
    %13 = math.exp %12 : vector<8x128xf32>
    %cst_9 = arith.constant 1.000000e+00 : f32
    %14 = vector.broadcast %cst_9 : f32 to vector<8x128xf32>
    %15 = arith.addf %14, %13 : vector<8x128xf32>
    %16 = arith.divf %14, %15 : vector<8x128xf32>
    %17 = vector.extract_strided_slice %10 {offsets = [0, 128], sizes = [8, 128], strides = [1, 1]} : vector<8x512xf32> to vector<8x128xf32>
    %18 = arith.negf %17 : vector<8x128xf32>
    %19 = math.exp %18 : vector<8x128xf32>
    %cst_10 = arith.constant 1.000000e+00 : f32
    %20 = vector.broadcast %cst_10 : f32 to vector<8x128xf32>
    %21 = arith.addf %20, %19 : vector<8x128xf32>
    %22 = arith.divf %20, %21 : vector<8x128xf32>
    %23 = vector.extract_strided_slice %10 {offsets = [0, 256], sizes = [8, 128], strides = [1, 1]} : vector<8x512xf32> to vector<8x128xf32>
    %24 = math.tanh %23 : vector<8x128xf32>
    %25 = vector.extract_strided_slice %10 {offsets = [0, 384], sizes = [8, 128], strides = [1, 1]} : vector<8x512xf32> to vector<8x128xf32>
    %26 = arith.negf %25 : vector<8x128xf32>
    %27 = math.exp %26 : vector<8x128xf32>
    %cst_11 = arith.constant 1.000000e+00 : f32
    %28 = vector.broadcast %cst_11 : f32 to vector<8x128xf32>
    %29 = arith.addf %28, %27 : vector<8x128xf32>
    %30 = arith.divf %28, %29 : vector<8x128xf32>
    %31 = arith.mulf %22, %5 : vector<8x128xf32>
    %32 = arith.mulf %16, %24 : vector<8x128xf32>
    %33 = arith.addf %31, %32 : vector<8x128xf32>
    %34 = math.tanh %33 : vector<8x128xf32>
    %35 = arith.mulf %30, %34 : vector<8x128xf32>
    %36 = arith.index_cast %c0_i32_6 : i32 to index
    %c0_12 = arith.constant 0 : index
    %c0_13 = arith.constant 0 : index
    %37 = vector.load %arg4[%36, %c0_12, %c0_13] : memref<8x8x128xf32, #tpu.memory_space<vmem>>, vector<1x8x128xf32>
    %38 = vector.shape_cast %37 : vector<1x8x128xf32> to vector<8x128xf32>
    %39 = vector.shape_cast %35 : vector<8x128xf32> to vector<1x8x128xf32>
    tpu.vector_store %arg4[%36, %c0_12, %c0_13], %39 {strides = array<i32>} : memref<8x8x128xf32, #tpu.memory_space<vmem>>, vector<1x8x128xf32>,
    %c1_i32 = arith.constant 1 : i32
    %40 = arith.index_cast %c1_i32 : i32 to index
    %c0_14 = arith.constant 0 : index
    %c0_15 = arith.constant 0 : index
    %41 = vector.load %arg2[%40, %c0_14, %c0_15] : memref<8x8x512xf32, #tpu.memory_space<vmem>>, vector<1x8x512xf32>
    %42 = vector.shape_cast %41 : vector<1x8x512xf32> to vector<8x512xf32>
    %cst_16 = arith.constant dense<0.000000e+00> : vector<8x512xf32>
    %43 = tpu.matmul %35, %3, %cst_16 {dimension_numbers = #tpu.dot_dimension_numbers<[1], [0], [0], [1], [0, 0, 1, 1], [], []>} : vector<8x128xf32>, vector<128x512xf32>, vector<8x512xf32> -> vector<8x512xf32>
    %44 = arith.addf %42, %43 : vector<8x512xf32>
    %45 = vector.extract_strided_slice %44 {offsets = [0, 0], sizes = [8, 128], strides = [1, 1]} : vector<8x512xf32> to vector<8x128xf32>
    %46 = arith.negf %45 : vector<8x128xf32>
    %47 = math.exp %46 : vector<8x128xf32>
    %cst_17 = arith.constant 1.000000e+00 : f32
    %48 = vector.broadcast %cst_17 : f32 to vector<8x128xf32>
    %49 = arith.addf %48, %47 : vector<8x128xf32>
    %50 = arith.divf %48, %49 : vector<8x128xf32>
    %51 = vector.extract_strided_slice %44 {offsets = [0, 128], sizes = [8, 128], strides = [1, 1]} : vector<8x512xf32> to vector<8x128xf32>
    %52 = arith.negf %51 : vector<8x128xf32>
    %53 = math.exp %52 : vector<8x128xf32>
    %cst_18 = arith.constant 1.000000e+00 : f32
    %54 = vector.broadcast %cst_18 : f32 to vector<8x128xf32>
    %55 = arith.addf %54, %53 : vector<8x128xf32>
    %56 = arith.divf %54, %55 : vector<8x128xf32>
    %57 = vector.extract_strided_slice %44 {offsets = [0, 256], sizes = [8, 128], strides = [1, 1]} : vector<8x512xf32> to vector<8x128xf32>
    %58 = math.tanh %57 : vector<8x128xf32>
    %59 = vector.extract_strided_slice %44 {offsets = [0, 384], sizes = [8, 128], strides = [1, 1]} : vector<8x512xf32> to vector<8x128xf32>
    %60 = arith.negf %59 : vector<8x128xf32>
    %61 = math.exp %60 : vector<8x128xf32>
    %cst_19 = arith.constant 1.000000e+00 : f32
    %62 = vector.broadcast %cst_19 : f32 to vector<8x128xf32>
    %63 = arith.addf %62, %61 : vector<8x128xf32>
    %64 = arith.divf %62, %63 : vector<8x128xf32>
    %65 = arith.mulf %56, %33 : vector<8x128xf32>
    %66 = arith.mulf %50, %58 : vector<8x128xf32>
    %67 = arith.addf %65, %66 : vector<8x128xf32>
    %68 = math.tanh %67 : vector<8x128xf32>
    %69 = arith.mulf %64, %68 : vector<8x128xf32>
    %70 = arith.index_cast %c1_i32 : i32 to index
    %c0_20 = arith.constant 0 : index
    %c0_21 = arith.constant 0 : index
    %71 = vector.load %arg4[%70, %c0_20, %c0_21] : memref<8x8x128xf32, #tpu.memory_space<vmem>>, vector<1x8x128xf32>
    %72 = vector.shape_cast %71 : vector<1x8x128xf32> to vector<8x128xf32>
    %73 = vector.shape_cast %69 : vector<8x128xf32> to vector<1x8x128xf32>
    tpu.vector_store %arg4[%70, %c0_20, %c0_21], %73 {strides = array<i32>} : memref<8x8x128xf32, #tpu.memory_space<vmem>>, vector<1x8x128xf32>,
    %c2_i32 = arith.constant 2 : i32
    %74 = arith.index_cast %c2_i32 : i32 to index
    %c0_22 = arith.constant 0 : index
    %c0_23 = arith.constant 0 : index
    %75 = vector.load %arg2[%74, %c0_22, %c0_23] : memref<8x8x512xf32, #tpu.memory_space<vmem>>, vector<1x8x512xf32>
    %76 = vector.shape_cast %75 : vector<1x8x512xf32> to vector<8x512xf32>
    %cst_24 = arith.constant dense<0.000000e+00> : vector<8x512xf32>
    %77 = tpu.matmul %69, %3, %cst_24 {dimension_numbers = #tpu.dot_dimension_numbers<[1], [0], [0], [1], [0, 0, 1, 1], [], []>} : vector<8x128xf32>, vector<128x512xf32>, vector<8x512xf32> -> vector<8x512xf32>
    %78 = arith.addf %76, %77 : vector<8x512xf32>
    %79 = vector.extract_strided_slice %78 {offsets = [0, 0], sizes = [8, 128], strides = [1, 1]} : vector<8x512xf32> to vector<8x128xf32>
    %80 = arith.negf %79 : vector<8x128xf32>
    %81 = math.exp %80 : vector<8x128xf32>
    %cst_25 = arith.constant 1.000000e+00 : f32
    %82 = vector.broadcast %cst_25 : f32 to vector<8x128xf32>
    %83 = arith.addf %82, %81 : vector<8x128xf32>
    %84 = arith.divf %82, %83 : vector<8x128xf32>
    %85 = vector.extract_strided_slice %78 {offsets = [0, 128], sizes = [8, 128], strides = [1, 1]} : vector<8x512xf32> to vector<8x128xf32>
    %86 = arith.negf %85 : vector<8x128xf32>
    %87 = math.exp %86 : vector<8x128xf32>
    %cst_26 = arith.constant 1.000000e+00 : f32
    %88 = vector.broadcast %cst_26 : f32 to vector<8x128xf32>
    %89 = arith.addf %88, %87 : vector<8x128xf32>
    %90 = arith.divf %88, %89 : vector<8x128xf32>
    %91 = vector.extract_strided_slice %78 {offsets = [0, 256], sizes = [8, 128], strides = [1, 1]} : vector<8x512xf32> to vector<8x128xf32>
    %92 = math.tanh %91 : vector<8x128xf32>
    %93 = vector.extract_strided_slice %78 {offsets = [0, 384], sizes = [8, 128], strides = [1, 1]} : vector<8x512xf32> to vector<8x128xf32>
    %94 = arith.negf %93 : vector<8x128xf32>
    %95 = math.exp %94 : vector<8x128xf32>
    %cst_27 = arith.constant 1.000000e+00 : f32
    %96 = vector.broadcast %cst_27 : f32 to vector<8x128xf32>
    %97 = arith.addf %96, %95 : vector<8x128xf32>
    %98 = arith.divf %96, %97 : vector<8x128xf32>
    %99 = arith.mulf %90, %67 : vector<8x128xf32>
    %100 = arith.mulf %84, %92 : vector<8x128xf32>
    %101 = arith.addf %99, %100 : vector<8x128xf32>
    %102 = math.tanh %101 : vector<8x128xf32>
    %103 = arith.mulf %98, %102 : vector<8x128xf32>
    %104 = arith.index_cast %c2_i32 : i32 to index
    %c0_28 = arith.constant 0 : index
    %c0_29 = arith.constant 0 : index
    %105 = vector.load %arg4[%104, %c0_28, %c0_29] : memref<8x8x128xf32, #tpu.memory_space<vmem>>, vector<1x8x128xf32>
    %106 = vector.shape_cast %105 : vector<1x8x128xf32> to vector<8x128xf32>
    %107 = vector.shape_cast %103 : vector<8x128xf32> to vector<1x8x128xf32>
    tpu.vector_store %arg4[%104, %c0_28, %c0_29], %107 {strides = array<i32>} : memref<8x8x128xf32, #tpu.memory_space<vmem>>, vector<1x8x128xf32>,
    %c3_i32 = arith.constant 3 : i32
    %108 = arith.index_cast %c3_i32 : i32 to index
    %c0_30 = arith.constant 0 : index
    %c0_31 = arith.constant 0 : index
    %109 = vector.load %arg2[%108, %c0_30, %c0_31] : memref<8x8x512xf32, #tpu.memory_space<vmem>>, vector<1x8x512xf32>
    %110 = vector.shape_cast %109 : vector<1x8x512xf32> to vector<8x512xf32>
    %cst_32 = arith.constant dense<0.000000e+00> : vector<8x512xf32>
    %111 = tpu.matmul %103, %3, %cst_32 {dimension_numbers = #tpu.dot_dimension_numbers<[1], [0], [0], [1], [0, 0, 1, 1], [], []>} : vector<8x128xf32>, vector<128x512xf32>, vector<8x512xf32> -> vector<8x512xf32>
    %112 = arith.addf %110, %111 : vector<8x512xf32>
    %113 = vector.extract_strided_slice %112 {offsets = [0, 0], sizes = [8, 128], strides = [1, 1]} : vector<8x512xf32> to vector<8x128xf32>
    %114 = arith.negf %113 : vector<8x128xf32>
    %115 = math.exp %114 : vector<8x128xf32>
    %cst_33 = arith.constant 1.000000e+00 : f32
    %116 = vector.broadcast %cst_33 : f32 to vector<8x128xf32>
    %117 = arith.addf %116, %115 : vector<8x128xf32>
    %118 = arith.divf %116, %117 : vector<8x128xf32>
    %119 = vector.extract_strided_slice %112 {offsets = [0, 128], sizes = [8, 128], strides = [1, 1]} : vector<8x512xf32> to vector<8x128xf32>
    %120 = arith.negf %119 : vector<8x128xf32>
    %121 = math.exp %120 : vector<8x128xf32>
    %cst_34 = arith.constant 1.000000e+00 : f32
    %122 = vector.broadcast %cst_34 : f32 to vector<8x128xf32>
    %123 = arith.addf %122, %121 : vector<8x128xf32>
    %124 = arith.divf %122, %123 : vector<8x128xf32>
    %125 = vector.extract_strided_slice %112 {offsets = [0, 256], sizes = [8, 128], strides = [1, 1]} : vector<8x512xf32> to vector<8x128xf32>
    %126 = math.tanh %125 : vector<8x128xf32>
    %127 = vector.extract_strided_slice %112 {offsets = [0, 384], sizes = [8, 128], strides = [1, 1]} : vector<8x512xf32> to vector<8x128xf32>
    %128 = arith.negf %127 : vector<8x128xf32>
    %129 = math.exp %128 : vector<8x128xf32>
    %cst_35 = arith.constant 1.000000e+00 : f32
    %130 = vector.broadcast %cst_35 : f32 to vector<8x128xf32>
    %131 = arith.addf %130, %129 : vector<8x128xf32>
    %132 = arith.divf %130, %131 : vector<8x128xf32>
    %133 = arith.mulf %124, %101 : vector<8x128xf32>
    %134 = arith.mulf %118, %126 : vector<8x128xf32>
    %135 = arith.addf %133, %134 : vector<8x128xf32>
    %136 = math.tanh %135 : vector<8x128xf32>
    %137 = arith.mulf %132, %136 : vector<8x128xf32>
    %138 = arith.index_cast %c3_i32 : i32 to index
    %c0_36 = arith.constant 0 : index
    %c0_37 = arith.constant 0 : index
    %139 = vector.load %arg4[%138, %c0_36, %c0_37] : memref<8x8x128xf32, #tpu.memory_space<vmem>>, vector<1x8x128xf32>
    %140 = vector.shape_cast %139 : vector<1x8x128xf32> to vector<8x128xf32>
    %141 = vector.shape_cast %137 : vector<8x128xf32> to vector<1x8x128xf32>
    tpu.vector_store %arg4[%138, %c0_36, %c0_37], %141 {strides = array<i32>} : memref<8x8x128xf32, #tpu.memory_space<vmem>>, vector<1x8x128xf32>,
    %c4_i32 = arith.constant 4 : i32
    %142 = arith.index_cast %c4_i32 : i32 to index
    %c0_38 = arith.constant 0 : index
    %c0_39 = arith.constant 0 : index
    %143 = vector.load %arg2[%142, %c0_38, %c0_39] : memref<8x8x512xf32, #tpu.memory_space<vmem>>, vector<1x8x512xf32>
    %144 = vector.shape_cast %143 : vector<1x8x512xf32> to vector<8x512xf32>
    %cst_40 = arith.constant dense<0.000000e+00> : vector<8x512xf32>
    %145 = tpu.matmul %137, %3, %cst_40 {dimension_numbers = #tpu.dot_dimension_numbers<[1], [0], [0], [1], [0, 0, 1, 1], [], []>} : vector<8x128xf32>, vector<128x512xf32>, vector<8x512xf32> -> vector<8x512xf32>
    %146 = arith.addf %144, %145 : vector<8x512xf32>
    %147 = vector.extract_strided_slice %146 {offsets = [0, 0], sizes = [8, 128], strides = [1, 1]} : vector<8x512xf32> to vector<8x128xf32>
    %148 = arith.negf %147 : vector<8x128xf32>
    %149 = math.exp %148 : vector<8x128xf32>
    %cst_41 = arith.constant 1.000000e+00 : f32
    %150 = vector.broadcast %cst_41 : f32 to vector<8x128xf32>
    %151 = arith.addf %150, %149 : vector<8x128xf32>
    %152 = arith.divf %150, %151 : vector<8x128xf32>
    %153 = vector.extract_strided_slice %146 {offsets = [0, 128], sizes = [8, 128], strides = [1, 1]} : vector<8x512xf32> to vector<8x128xf32>
    %154 = arith.negf %153 : vector<8x128xf32>
    %155 = math.exp %154 : vector<8x128xf32>
    %cst_42 = arith.constant 1.000000e+00 : f32
    %156 = vector.broadcast %cst_42 : f32 to vector<8x128xf32>
    %157 = arith.addf %156, %155 : vector<8x128xf32>
    %158 = arith.divf %156, %157 : vector<8x128xf32>
    %159 = vector.extract_strided_slice %146 {offsets = [0, 256], sizes = [8, 128], strides = [1, 1]} : vector<8x512xf32> to vector<8x128xf32>
    %160 = math.tanh %159 : vector<8x128xf32>
    %161 = vector.extract_strided_slice %146 {offsets = [0, 384], sizes = [8, 128], strides = [1, 1]} : vector<8x512xf32> to vector<8x128xf32>
    %162 = arith.negf %161 : vector<8x128xf32>
    %163 = math.exp %162 : vector<8x128xf32>
    %cst_43 = arith.constant 1.000000e+00 : f32
    %164 = vector.broadcast %cst_43 : f32 to vector<8x128xf32>
    %165 = arith.addf %164, %163 : vector<8x128xf32>
    %166 = arith.divf %164, %165 : vector<8x128xf32>
    %167 = arith.mulf %158, %135 : vector<8x128xf32>
    %168 = arith.mulf %152, %160 : vector<8x128xf32>
    %169 = arith.addf %167, %168 : vector<8x128xf32>
    %170 = math.tanh %169 : vector<8x128xf32>
    %171 = arith.mulf %166, %170 : vector<8x128xf32>
    %172 = arith.index_cast %c4_i32 : i32 to index
    %c0_44 = arith.constant 0 : index
    %c0_45 = arith.constant 0 : index
    %173 = vector.load %arg4[%172, %c0_44, %c0_45] : memref<8x8x128xf32, #tpu.memory_space<vmem>>, vector<1x8x128xf32>
    %174 = vector.shape_cast %173 : vector<1x8x128xf32> to vector<8x128xf32>
    %175 = vector.shape_cast %171 : vector<8x128xf32> to vector<1x8x128xf32>
    tpu.vector_store %arg4[%172, %c0_44, %c0_45], %175 {strides = array<i32>} : memref<8x8x128xf32, #tpu.memory_space<vmem>>, vector<1x8x128xf32>,
    %c5_i32 = arith.constant 5 : i32
    %176 = arith.index_cast %c5_i32 : i32 to index
    %c0_46 = arith.constant 0 : index
    %c0_47 = arith.constant 0 : index
    %177 = vector.load %arg2[%176, %c0_46, %c0_47] : memref<8x8x512xf32, #tpu.memory_space<vmem>>, vector<1x8x512xf32>
    %178 = vector.shape_cast %177 : vector<1x8x512xf32> to vector<8x512xf32>
    %cst_48 = arith.constant dense<0.000000e+00> : vector<8x512xf32>
    %179 = tpu.matmul %171, %3, %cst_48 {dimension_numbers = #tpu.dot_dimension_numbers<[1], [0], [0], [1], [0, 0, 1, 1], [], []>} : vector<8x128xf32>, vector<128x512xf32>, vector<8x512xf32> -> vector<8x512xf32>
    %180 = arith.addf %178, %179 : vector<8x512xf32>
    %181 = vector.extract_strided_slice %180 {offsets = [0, 0], sizes = [8, 128], strides = [1, 1]} : vector<8x512xf32> to vector<8x128xf32>
    %182 = arith.negf %181 : vector<8x128xf32>
    %183 = math.exp %182 : vector<8x128xf32>
    %cst_49 = arith.constant 1.000000e+00 : f32
    %184 = vector.broadcast %cst_49 : f32 to vector<8x128xf32>
    %185 = arith.addf %184, %183 : vector<8x128xf32>
    %186 = arith.divf %184, %185 : vector<8x128xf32>
    %187 = vector.extract_strided_slice %180 {offsets = [0, 128], sizes = [8, 128], strides = [1, 1]} : vector<8x512xf32> to vector<8x128xf32>
    %188 = arith.negf %187 : vector<8x128xf32>
    %189 = math.exp %188 : vector<8x128xf32>
    %cst_50 = arith.constant 1.000000e+00 : f32
    %190 = vector.broadcast %cst_50 : f32 to vector<8x128xf32>
    %191 = arith.addf %190, %189 : vector<8x128xf32>
    %192 = arith.divf %190, %191 : vector<8x128xf32>
    %193 = vector.extract_strided_slice %180 {offsets = [0, 256], sizes = [8, 128], strides = [1, 1]} : vector<8x512xf32> to vector<8x128xf32>
    %194 = math.tanh %193 : vector<8x128xf32>
    %195 = vector.extract_strided_slice %180 {offsets = [0, 384], sizes = [8, 128], strides = [1, 1]} : vector<8x512xf32> to vector<8x128xf32>
    %196 = arith.negf %195 : vector<8x128xf32>
    %197 = math.exp %196 : vector<8x128xf32>
    %cst_51 = arith.constant 1.000000e+00 : f32
    %198 = vector.broadcast %cst_51 : f32 to vector<8x128xf32>
    %199 = arith.addf %198, %197 : vector<8x128xf32>
    %200 = arith.divf %198, %199 : vector<8x128xf32>
    %201 = arith.mulf %192, %169 : vector<8x128xf32>
    %202 = arith.mulf %186, %194 : vector<8x128xf32>
    %203 = arith.addf %201, %202 : vector<8x128xf32>
    %204 = math.tanh %203 : vector<8x128xf32>
    %205 = arith.mulf %200, %204 : vector<8x128xf32>
    %206 = arith.index_cast %c5_i32 : i32 to index
    %c0_52 = arith.constant 0 : index
    %c0_53 = arith.constant 0 : index
    %207 = vector.load %arg4[%206, %c0_52, %c0_53] : memref<8x8x128xf32, #tpu.memory_space<vmem>>, vector<1x8x128xf32>
    %208 = vector.shape_cast %207 : vector<1x8x128xf32> to vector<8x128xf32>
    %209 = vector.shape_cast %205 : vector<8x128xf32> to vector<1x8x128xf32>
    tpu.vector_store %arg4[%206, %c0_52, %c0_53], %209 {strides = array<i32>} : memref<8x8x128xf32, #tpu.memory_space<vmem>>, vector<1x8x128xf32>,
    %c6_i32 = arith.constant 6 : i32
    %210 = arith.index_cast %c6_i32 : i32 to index
    %c0_54 = arith.constant 0 : index
    %c0_55 = arith.constant 0 : index
    %211 = vector.load %arg2[%210, %c0_54, %c0_55] : memref<8x8x512xf32, #tpu.memory_space<vmem>>, vector<1x8x512xf32>
    %212 = vector.shape_cast %211 : vector<1x8x512xf32> to vector<8x512xf32>
    %cst_56 = arith.constant dense<0.000000e+00> : vector<8x512xf32>
    %213 = tpu.matmul %205, %3, %cst_56 {dimension_numbers = #tpu.dot_dimension_numbers<[1], [0], [0], [1], [0, 0, 1, 1], [], []>} : vector<8x128xf32>, vector<128x512xf32>, vector<8x512xf32> -> vector<8x512xf32>
    %214 = arith.addf %212, %213 : vector<8x512xf32>
    %215 = vector.extract_strided_slice %214 {offsets = [0, 0], sizes = [8, 128], strides = [1, 1]} : vector<8x512xf32> to vector<8x128xf32>
    %216 = arith.negf %215 : vector<8x128xf32>
    %217 = math.exp %216 : vector<8x128xf32>
    %cst_57 = arith.constant 1.000000e+00 : f32
    %218 = vector.broadcast %cst_57 : f32 to vector<8x128xf32>
    %219 = arith.addf %218, %217 : vector<8x128xf32>
    %220 = arith.divf %218, %219 : vector<8x128xf32>
    %221 = vector.extract_strided_slice %214 {offsets = [0, 128], sizes = [8, 128], strides = [1, 1]} : vector<8x512xf32> to vector<8x128xf32>
    %222 = arith.negf %221 : vector<8x128xf32>
    %223 = math.exp %222 : vector<8x128xf32>
    %cst_58 = arith.constant 1.000000e+00 : f32
    %224 = vector.broadcast %cst_58 : f32 to vector<8x128xf32>
    %225 = arith.addf %224, %223 : vector<8x128xf32>
    %226 = arith.divf %224, %225 : vector<8x128xf32>
    %227 = vector.extract_strided_slice %214 {offsets = [0, 256], sizes = [8, 128], strides = [1, 1]} : vector<8x512xf32> to vector<8x128xf32>
    %228 = math.tanh %227 : vector<8x128xf32>
    %229 = vector.extract_strided_slice %214 {offsets = [0, 384], sizes = [8, 128], strides = [1, 1]} : vector<8x512xf32> to vector<8x128xf32>
    %230 = arith.negf %229 : vector<8x128xf32>
    %231 = math.exp %230 : vector<8x128xf32>
    %cst_59 = arith.constant 1.000000e+00 : f32
    %232 = vector.broadcast %cst_59 : f32 to vector<8x128xf32>
    %233 = arith.addf %232, %231 : vector<8x128xf32>
    %234 = arith.divf %232, %233 : vector<8x128xf32>
    %235 = arith.mulf %226, %203 : vector<8x128xf32>
    %236 = arith.mulf %220, %228 : vector<8x128xf32>
    %237 = arith.addf %235, %236 : vector<8x128xf32>
    %238 = math.tanh %237 : vector<8x128xf32>
    %239 = arith.mulf %234, %238 : vector<8x128xf32>
    %240 = arith.index_cast %c6_i32 : i32 to index
    %c0_60 = arith.constant 0 : index
    %c0_61 = arith.constant 0 : index
    %241 = vector.load %arg4[%240, %c0_60, %c0_61] : memref<8x8x128xf32, #tpu.memory_space<vmem>>, vector<1x8x128xf32>
    %242 = vector.shape_cast %241 : vector<1x8x128xf32> to vector<8x128xf32>
    %243 = vector.shape_cast %239 : vector<8x128xf32> to vector<1x8x128xf32>
    tpu.vector_store %arg4[%240, %c0_60, %c0_61], %243 {strides = array<i32>} : memref<8x8x128xf32, #tpu.memory_space<vmem>>, vector<1x8x128xf32>,
    %c7_i32 = arith.constant 7 : i32
    %244 = arith.index_cast %c7_i32 : i32 to index
    %c0_62 = arith.constant 0 : index
    %c0_63 = arith.constant 0 : index
    %245 = vector.load %arg2[%244, %c0_62, %c0_63] : memref<8x8x512xf32, #tpu.memory_space<vmem>>, vector<1x8x512xf32>
    %246 = vector.shape_cast %245 : vector<1x8x512xf32> to vector<8x512xf32>
    %cst_64 = arith.constant dense<0.000000e+00> : vector<8x512xf32>
    %247 = tpu.matmul %239, %3, %cst_64 {dimension_numbers = #tpu.dot_dimension_numbers<[1], [0], [0], [1], [0, 0, 1, 1], [], []>} : vector<8x128xf32>, vector<128x512xf32>, vector<8x512xf32> -> vector<8x512xf32>
    %248 = arith.addf %246, %247 : vector<8x512xf32>
    %249 = vector.extract_strided_slice %248 {offsets = [0, 0], sizes = [8, 128], strides = [1, 1]} : vector<8x512xf32> to vector<8x128xf32>
    %250 = arith.negf %249 : vector<8x128xf32>
    %251 = math.exp %250 : vector<8x128xf32>
    %cst_65 = arith.constant 1.000000e+00 : f32
    %252 = vector.broadcast %cst_65 : f32 to vector<8x128xf32>
    %253 = arith.addf %252, %251 : vector<8x128xf32>
    %254 = arith.divf %252, %253 : vector<8x128xf32>
    %255 = vector.extract_strided_slice %248 {offsets = [0, 128], sizes = [8, 128], strides = [1, 1]} : vector<8x512xf32> to vector<8x128xf32>
    %256 = arith.negf %255 : vector<8x128xf32>
    %257 = math.exp %256 : vector<8x128xf32>
    %cst_66 = arith.constant 1.000000e+00 : f32
    %258 = vector.broadcast %cst_66 : f32 to vector<8x128xf32>
    %259 = arith.addf %258, %257 : vector<8x128xf32>
    %260 = arith.divf %258, %259 : vector<8x128xf32>
    %261 = vector.extract_strided_slice %248 {offsets = [0, 256], sizes = [8, 128], strides = [1, 1]} : vector<8x512xf32> to vector<8x128xf32>
    %262 = math.tanh %261 : vector<8x128xf32>
    %263 = vector.extract_strided_slice %248 {offsets = [0, 384], sizes = [8, 128], strides = [1, 1]} : vector<8x512xf32> to vector<8x128xf32>
    %264 = arith.negf %263 : vector<8x128xf32>
    %265 = math.exp %264 : vector<8x128xf32>
    %cst_67 = arith.constant 1.000000e+00 : f32
    %266 = vector.broadcast %cst_67 : f32 to vector<8x128xf32>
    %267 = arith.addf %266, %265 : vector<8x128xf32>
    %268 = arith.divf %266, %267 : vector<8x128xf32>
    %269 = arith.mulf %260, %237 : vector<8x128xf32>
    %270 = arith.mulf %254, %262 : vector<8x128xf32>
    %271 = arith.addf %269, %270 : vector<8x128xf32>
    %272 = math.tanh %271 : vector<8x128xf32>
    %273 = arith.mulf %268, %272 : vector<8x128xf32>
    %274 = arith.index_cast %c7_i32 : i32 to index
    %c0_68 = arith.constant 0 : index
    %c0_69 = arith.constant 0 : index
    %275 = vector.load %arg4[%274, %c0_68, %c0_69] : memref<8x8x128xf32, #tpu.memory_space<vmem>>, vector<1x8x128xf32>
    %276 = vector.shape_cast %275 : vector<1x8x128xf32> to vector<8x128xf32>
    %277 = vector.shape_cast %273 : vector<8x128xf32> to vector<1x8x128xf32>
    tpu.vector_store %arg4[%274, %c0_68, %c0_69], %277 {strides = array<i32>} : memref<8x8x128xf32, #tpu.memory_space<vmem>>, vector<1x8x128xf32>,
    %c8_i32 = arith.constant 8 : i32
    %c0_70 = arith.constant 0 : index
    %c0_71 = arith.constant 0 : index
    %278 = vector.load %arg5[%c0_70, %c0_71] : memref<8x128xf32, #tpu.memory_space<vmem>>, vector<8x128xf32>
    tpu.vector_store %arg5[%c0_70, %c0_71], %273 {strides = array<i32>} : memref<8x128xf32, #tpu.memory_space<vmem>>, vector<8x128xf32>,
    %c0_72 = arith.constant 0 : index
    %c0_73 = arith.constant 0 : index
    %279 = vector.load %arg6[%c0_72, %c0_73] : memref<8x128xf32, #tpu.memory_space<vmem>>, vector<8x128xf32>
    tpu.vector_store %arg6[%c0_72, %c0_73], %271 {strides = array<i32>} : memref<8x128xf32, #tpu.memory_space<vmem>>, vector<8x128xf32>,
    return
  }
  func.func @transform_0(%arg0: i32, %arg1: i32) -> (i32, i32, i32) {
    %c0_i32 = arith.constant 0 : i32
    %c0_i32_0 = arith.constant 0 : i32
    return %arg1, %arg0, %c0_i32 : i32, i32, i32
  }
  func.func @transform_1(%arg0: i32, %arg1: i32) -> (i32, i32) {
    %c0_i32 = arith.constant 0 : i32
    %c0_i32_0 = arith.constant 0 : i32
    %c0_i32_1 = arith.constant 0 : i32
    return %c0_i32, %c0_i32_0 : i32, i32
  }
  func.func @transform_2(%arg0: i32, %arg1: i32) -> (i32, i32, i32) {
    %c0_i32 = arith.constant 0 : i32
    %c0_i32_0 = arith.constant 0 : i32
    return %arg1, %arg0, %c0_i32 : i32, i32, i32
  }
}

</mosaic_0001>

<bundles_post_ra>
// kernel: tpu_custom_call.1
= control target key start
LH: loop header
LB: loop body
LE: loop exit
PB: predicated region body
PF: predicated region fallthrough
CT: control target
= control target key end

     0   :  { %7 = vsyncpa [#allocation5], 0  ;;  %s2711_s0 = inlined_call_operand.hbm [shape: f32[8,8,512], index: 0, kind: input, shape index: {}]   ;;  %s2712_s1 = inlined_call_operand.hbm [shape: f32[128,512], index: 1, kind: input, shape index: {}]   ;;  %s2713_s2 = inlined_call_operand.hbm [shape: f32[8,8,128], index: 2, kind: output, shape index: {}]  }
   0x1   :  { %8 = vsyncpa [#allocation8], 0 }
   0x2   :  { %9 = vsyncpa [#allocation6], 0  ;;  %s2290_s9 = smov [#allocation4]   ;;  %s2218_s13 = scalar_lea.hbm %s2711_s0, 4096 }
   0x3   :  { %s15_s10 = sshll.u32 %s2290_s9, 4  ;;  %p2219_p0 = scmp.ne.s32.totalorder %s2711_s0, %s2218_s13  ;;  %s16_s10 = int_to_ptr.vmem [resolvable:$true] %s15_s10 }
   0x4   :  { %p2222_p1 = scmp.lt.u32.totalorder %s2218_s13, %s2711_s0 }
   0x6   :  { %p2224_p2 = pnand %p2222_p1, %p2219_p0 }
   0x8   :  { %2227 = shalt.err (!%p2224_p2)
}
   0x9   :  { %s2228_s18 = scalar_lea.vmem %s16_s10, 4096  ;;  %p2233_p4 = scmp.lt.s32.totalorder %s16_s10, %s16_s10 }
   0xa   :  { %p2229_p3 = scmp.ne.s32.totalorder %s16_s10, %s2228_s18  ;;  %p2234_p5 = scmp.lt.s32.totalorder %s2228_s18, %s2228_s18 }
   0xc   :  { %p2235_p6 = por %p2234_p5, %p2233_p4 }
   0xe   :  { %p2236_p7 = pnand %p2235_p6, %p2229_p3 }
  0x10   :  { %2239 = shalt.err (!%p2236_p7)
}
  0x11   :  { %s2291_s19 = smov 512   ;;  %s2292_s20 = smov 32  }
  0x12   :  { %21 = dma.hbm_to_vmem [thread:$0]  %s2711_s0, 4096, %s16_s10, [#allocation5], %s2291_s19, %s2291_s19, %s2292_s20  }
  0x13   :  { %s2293_s23 = smov [#allocation7]   ;;  %s2240_s27 = scalar_lea.hbm %s2712_s1, 8192 }
  0x14   :  { %s27_s24 = sshll.u32 %s2293_s23, 4  ;;  %p2241_p8 = scmp.ne.s32.totalorder %s2712_s1, %s2240_s27  ;;  %s28_s24 = int_to_ptr.vmem [resolvable:$true] %s27_s24 }
  0x15   :  { %p2244_p9 = scmp.lt.u32.totalorder %s2240_s27, %s2712_s1 }
  0x17   :  { %p2246_p10 = pnand %p2244_p9, %p2241_p8 }
  0x19   :  { %2249 = shalt.err (!%p2246_p10)
}
  0x1a   :  { %s2250_s4 = scalar_lea.vmem %s28_s24, 8192  ;;  %p2255_p12 = scmp.lt.s32.totalorder %s28_s24, %s28_s24 }
  0x1b   :  { %p2251_p11 = scmp.ne.s32.totalorder %s28_s24, %s2250_s4  ;;  %p2256_p13 = scmp.lt.s32.totalorder %s2250_s4, %s2250_s4 }
  0x1d   :  { %p2257_p0 = por %p2256_p13, %p2255_p12 }
  0x1f   :  { %p2258_p1 = pnand %p2257_p0, %p2251_p11 }
  0x21   :  { %2261 = shalt.err (!%p2258_p1)
}
  0x22   :  { %33 = dma.hbm_to_vmem [thread:$0]  %s2712_s1, 8192, %s28_s24, [#allocation8], %s2291_s19, %s2291_s19, %s2292_s20  }
  0x23   :  { %2284 = dma.done.wait [#allocation5], 4096  }
  0x24   :  { %2285 = vsyncadd [#allocation5], 4294963200 }
  0x25   :  { %2286 = dma.done.wait [#allocation8], 8192  }
  0x26   :  { %2287 = vsyncadd [#allocation8], 4294959104  ;;  %v2294_v0 = vmov 0.0   ;;  %v47_v1 = vld [vmem:[#allocation7 + $0x8] sm:$0xff]  ;;  %v46_v3 = vld [vmem:[#allocation7] sm:$0xff]  ;;  %s2295_s1 = smov [#allocation9]  }
  0x27   :  { %180 = vmatprep.mubr.f32.mxu0 %v2294_v0  ;;  %251 = vmatprep.mubr.f32.mxu1 %v2294_v0  ;;  %v51_v2 = vld [vmem:[#allocation7 + $0x28] sm:$0xff]  ;;  %v50_v5 = vld [vmem:[#allocation7 + $0x20] sm:$0xff]  ;;  %v49_v19 = vld [vmem:[#allocation7 + $0x18] sm:$0xff]  ;;  %s1533_s6 = sshll.u32 %s2295_s1, 4  ;;  %s1534_s6 = int_to_ptr.vmem [resolvable:$true] %s1533_s6 }
  0x28   :  { %v2339_v4 = vpack.c.bf16 %v51_v2, %v47_v1  ;;  %v55_v6 = vld [vmem:[#allocation7 + $0x48] sm:$0xff]  ;;  %v2341_v8 = vpack.c.bf16 %v50_v5, %v46_v3  ;;  %v54_v10 = vld [vmem:[#allocation7 + $0x40] sm:$0xff]  ;;  %v53_v20 = vld [vmem:[#allocation7 + $0x38] sm:$0xff]  ;;  %s2262_s7 = scalar_lea.vmem %s1534_s6, 1024  ;;  %p2267_p3 = scmp.lt.s32.totalorder %s1534_s6, %s1534_s6 }
  0x29   :  { %v59_v7 = vld [vmem:[#allocation7 + $0x68] sm:$0xff]  ;;  %v58_v11 = vld [vmem:[#allocation7 + $0x60] sm:$0xff]  ;;  %v2352_v22 = vpack.c.bf16 %v53_v20, %v49_v19  ;;  %v48_v23 = vld [vmem:[#allocation7 + $0x10] sm:$0xff]  ;;  %p2263_p2 = scmp.ne.s32.totalorder %s1534_s6, %s2262_s7  ;;  %p2268_p4 = scmp.lt.s32.totalorder %s2262_s7, %s2262_s7 }
  0x2a   :  { %v2343_v9 = vpack.c.bf16 %v59_v7, %v55_v6  ;;  %v63_v12 = vld [vmem:[#allocation7 + $0x88] sm:$0xff]  ;;  %1571 = vmatprep.subr.bf16.mxu0 %v2339_v4  ;;  %v2347_v14 = vpack.c.bf16 %v58_v11, %v54_v10  ;;  %v62_v15 = vld [vmem:[#allocation7 + $0x80] sm:$0xff]  ;;  %v52_v24 = vld [vmem:[#allocation7 + $0x30] sm:$0xff] }
  0x2b   :  { %v67_v13 = vld [vmem:[#allocation7 + $0xa8] sm:$0xff]  ;;  %1573 = vmatpush1.bf16.msra.mxu0 %v2341_v8  ;;  %v66_v16 = vld [vmem:[#allocation7 + $0xa0] sm:$0xff]  ;;  %v2354_v25 = vpack.c.bf16 %v52_v24, %v48_v23  ;;  %1603 = vmatprep.subr.bf16.mxu1 %v2352_v22  ;;  %v57_v27 = vld [vmem:[#allocation7 + $0x58] sm:$0xff]  ;;  %p2269_p5 = por %p2268_p4, %p2267_p3 }
  0x2c   :  { %1575 = vmatprep.subr.bf16.mxu0 %v2343_v9  ;;  %v2350_v17 = vpack.c.bf16 %v67_v13, %v63_v12  ;;  %v71_v18 = vld [vmem:[#allocation7 + $0xc8] sm:$0xff]  ;;  %v2357_v26 = vpack.c.bf16 %v66_v16, %v62_v15  ;;  %v61_v28 = vld [vmem:[#allocation7 + $0x78] sm:$0xff]  ;;  %v56_v29 = vld [vmem:[#allocation7 + $0x50] sm:$0xff] }
  0x2d   :  { %v75_v21 = vld [vmem:[#allocation7 + $0xe8] sm:$0xff]  ;;  %v70_v31 = vld [vmem:[#allocation7 + $0xc0] sm:$0xff]  ;;  %1605 = vmatpush1.bf16.msra.mxu1 %v2354_v25  ;;  %v2364_v33 = vpack.c.bf16 %v61_v28, %v57_v27  ;;  %v60_v34 = vld [vmem:[#allocation7 + $0x70] sm:$0xff]  ;;  %p2270_p6 = pnand %p2269_p5, %p2263_p2 }
  0x2e   :  { %v2361_v30 = vpack.c.bf16 %v75_v21, %v71_v18  ;;  %v74_v32 = vld [vmem:[#allocation7 + $0xe0] sm:$0xff]  ;;  %v79_v35 = vld [vmem:[#allocation7 + $0x108] sm:$0xff]  ;;  %v2366_v37 = vpack.c.bf16 %v60_v34, %v56_v29  ;;  %v65_v38 = vld [vmem:[#allocation7 + $0x98] sm:$0xff] }
  0x2f   :  { %1577 = vmatpush1.bf16.msra.mxu0 %v2347_v14  ;;  %v83_v36 = vld [vmem:[#allocation7 + $0x128] sm:$0xff]  ;;  %1607 = vmatprep.subr.bf16.mxu1 %v2364_v33  ;;  %v69_v39 = vld [vmem:[#allocation7 + $0xb8] sm:$0xff]  ;;  %v64_v40 = vld [vmem:[#allocation7 + $0x90] sm:$0xff]  ;;  %v2370_v42 = vpack.c.bf16 %v74_v32, %v70_v31 }
  0x30   :  { %1579 = vmatprep.subr.bf16.mxu0 %v2350_v17  ;;  %v68_v41 = vld [vmem:[#allocation7 + $0xb0] sm:$0xff]  ;;  %v78_v43 = vld [vmem:[#allocation7 + $0x100] sm:$0xff]  ;;  %v2372_v45 = vpack.c.bf16 %v69_v39, %v65_v38  ;;  %v2375_v46 = vpack.c.bf16 %v83_v36, %v79_v35  ;;  %v87_v47 = vld [vmem:[#allocation7 + $0x148] sm:$0xff] }
  0x31   :  { %v82_v44 = vld [vmem:[#allocation7 + $0x120] sm:$0xff]  ;;  %1609 = vmatpush1.bf16.msra.mxu1 %v2366_v37  ;;  %v2378_v48 = vpack.c.bf16 %v68_v41, %v64_v40  ;;  %v73_v49 = vld [vmem:[#allocation7 + $0xd8] sm:$0xff]  ;;  %v91_v51 = vld [vmem:[#allocation7 + $0x168] sm:$0xff] }
  0x32   :  { %v77_v50 = vld [vmem:[#allocation7 + $0xf8] sm:$0xff]  ;;  %1611 = vmatprep.subr.bf16.mxu1 %v2372_v45  ;;  %v72_v53 = vld [vmem:[#allocation7 + $0xd0] sm:$0xff]  ;;  %v2384_v55 = vpack.c.bf16 %v82_v44, %v78_v43  ;;  %v2387_v58 = vpack.c.bf16 %v91_v51, %v87_v47  ;;  %v86_v59 = vld [vmem:[#allocation7 + $0x140] sm:$0xff] }
  0x33   :  { %1581 = vmatpush1.bf16.msra.mxu0 %v2357_v26  ;;  %v2381_v52 = vpack.c.bf16 %v77_v50, %v73_v49  ;;  %v76_v54 = vld [vmem:[#allocation7 + $0xf0] sm:$0xff]  ;;  %v81_v56 = vld [vmem:[#allocation7 + $0x118] sm:$0xff]  ;;  %v90_v60 = vld [vmem:[#allocation7 + $0x160] sm:$0xff] }
  0x34   :  { %1583 = vmatprep.subr.bf16.mxu0 %v2361_v30  ;;  %v85_v57 = vld [vmem:[#allocation7 + $0x138] sm:$0xff]  ;;  %v95_v61 = vld [vmem:[#allocation7 + $0x188] sm:$0xff]  ;;  %v2390_v62 = vpack.c.bf16 %v76_v54, %v72_v53  ;;  %v80_v2 = vld [vmem:[#allocation7 + $0x110] sm:$0xff]  ;;  %v2396_v7 = vpack.c.bf16 %v90_v60, %v86_v59 }
  0x35   :  { %1613 = vmatpush1.bf16.msra.mxu1 %v2378_v48  ;;  %v99_v63 = vld [vmem:[#allocation7 + $0x1a8] sm:$0xff]  ;;  %v2393_v1 = vpack.c.bf16 %v85_v57, %v81_v56  ;;  %v84_v3 = vld [vmem:[#allocation7 + $0x130] sm:$0xff]  ;;  %v89_v5 = vld [vmem:[#allocation7 + $0x158] sm:$0xff] }
  0x36   :  { %1615 = vmatprep.subr.bf16.mxu1 %v2381_v52  ;;  %v93_v6 = vld [vmem:[#allocation7 + $0x178] sm:$0xff]  ;;  %v2399_v10 = vpack.c.bf16 %v99_v63, %v95_v61  ;;  %v94_v11 = vld [vmem:[#allocation7 + $0x180] sm:$0xff]  ;;  %v103_v13 = vld [vmem:[#allocation7 + $0x1c8] sm:$0xff]  ;;  %v2402_v15 = vpack.c.bf16 %v84_v3, %v80_v2 }
  0x37   :  { %1585 = vmatpush1.bf16.msra.mxu0 %v2370_v42  ;;  %v98_v12 = vld [vmem:[#allocation7 + $0x1a0] sm:$0xff]  ;;  %v107_v16 = vld [vmem:[#allocation7 + $0x1e8] sm:$0xff]  ;;  %v2405_v18 = vpack.c.bf16 %v93_v6, %v89_v5  ;;  %v88_v19 = vld [vmem:[#allocation7 + $0x150] sm:$0xff] }
  0x38   :  { %1587 = vmatprep.subr.bf16.mxu0 %v2375_v46  ;;  %v92_v20 = vld [vmem:[#allocation7 + $0x170] sm:$0xff]  ;;  %v97_v21 = vld [vmem:[#allocation7 + $0x198] sm:$0xff]  ;;  %v2408_v24 = vpack.c.bf16 %v98_v12, %v94_v11  ;;  %v2411_v27 = vpack.c.bf16 %v107_v16, %v103_v13  ;;  %v102_v28 = vld [vmem:[#allocation7 + $0x1c0] sm:$0xff] }
  0x39   :  { %1617 = vmatpush1.bf16.msra.mxu1 %v2390_v62  ;;  %v101_v23 = vld [vmem:[#allocation7 + $0x1b8] sm:$0xff]  ;;  %v106_v29 = vld [vmem:[#allocation7 + $0x1e0] sm:$0xff]  ;;  %v2414_v31 = vpack.c.bf16 %v92_v20, %v88_v19  ;;  %v96_v34 = vld [vmem:[#allocation7 + $0x190] sm:$0xff] }
  0x3a   :  { %1619 = vmatprep.subr.bf16.mxu1 %v2393_v1  ;;  %v2417_v32 = vpack.c.bf16 %v101_v23, %v97_v21  ;;  %v100_v35 = vld [vmem:[#allocation7 + $0x1b0] sm:$0xff]  ;;  %v105_v36 = vld [vmem:[#allocation7 + $0x1d8] sm:$0xff]  ;;  %v2420_v39 = vpack.c.bf16 %v106_v29, %v102_v28  ;;  %v112_v49 = vld [vmem:[#allocation4] sm:$0xff] }
  0x3b   :  { %1589 = vmatpush1.bf16.msra.mxu0 %v2384_v55  ;;  %v109_v38 = vld [vmem:[#allocation7 + $0x1f8] sm:$0xff]  ;;  %v2424_v40 = vpack.c.bf16 %v100_v35, %v96_v34  ;;  %v104_v43 = vld [vmem:[#allocation7 + $0x1d0] sm:$0xff]  ;;  %v113_v50 = vld [vmem:[#allocation4 + $0x8] sm:$0xff] }
  0x3c   :  { %1591 = vmatprep.subr.bf16.mxu0 %v2387_v58  ;;  %v2427_v41 = vpack.c.bf16 %v109_v38, %v105_v36  ;;  %v108_v44 = vld [vmem:[#allocation7 + $0x1f0] sm:$0xff]  ;;  %v115_v60 = vld [vmem:[#allocation4 + $0x18] sm:$0xff] }
  0x3d   :  { %1621 = vmatpush1.bf16.msra.mxu1 %v2402_v15  ;;  %v2431_v47 = vpack.c.bf16 %v108_v44, %v104_v43  ;;  %v114_v3 = vld [vmem:[#allocation4 + $0x10] sm:$0xff]  ;;  %v288_v44 = vld [vmem:[#allocation4 + $0x20] sm:$0xff] }
  0x3e   :  { %1623 = vmatprep.subr.bf16.mxu1 %v2405_v18 }
  0x3f   :  { %1593 = vmatpush1.bf16.msra.mxu0 %v2396_v7 }
  0x40   :  { %1595 = vmatprep.subr.bf16.mxu0 %v2399_v10 }
  0x41   :  { %1625 = vmatpush1.bf16.msra.mxu1 %v2414_v31 }
  0x42   :  { %1627 = vmatprep.subr.bf16.mxu1 %v2417_v32 }
  0x43   :  { %1597 = vmatpush1.bf16.msra.mxu0 %v2408_v24 }
  0x44   :  { %1599 = vmatprep.subr.bf16.mxu0 %v2411_v27 }
  0x45   :  { %1629 = vmatpush1.bf16.msra.mxu1 %v2424_v40 }
  0x46   :  { %1631 = vmatprep.subr.bf16.mxu1 %v2427_v41 }
  0x47   :  { %1601 = vmatpush1.bf16.msra.mxu0 %v2420_v39 }
  0x48   :  { %1635 = vmatprep.subr.bf16.mxu0 %v2339_v4 }
  0x49   :  { %1633 = vmatpush1.bf16.msra.mxu1 %v2431_v47 }
  0x4a   :  { %181 = vmatmul.mubr.f32.vlgmr.msra.gmra.mrb[0].mxu0 %v2294_v0  ;;  %1667 = vmatprep.subr.bf16.mxu1 %v2352_v22 }
  0x4b   :  { %1637 = vmatpush1.bf16.msra.mxu0 %v2341_v8  ;;  %356 = vmatprep.mubr.f32.mxu0 %v2294_v0 }
  0x4c   :  { %1639 = vmatprep.subr.bf16.mxu0 %v2343_v9  ;;  %252 = vmatmul.mubr.f32.vlgmr.msra.gmra.mrb[0].mxu1 %v2294_v0 }
  0x4d   :  { %1669 = vmatpush1.bf16.msra.mxu1 %v2354_v25  ;;  %427 = vmatprep.mubr.f32.mxu1 %v2294_v0 }
  0x4e   :  { %1671 = vmatprep.subr.bf16.mxu1 %v2364_v33 }
  0x4f   :  { %1641 = vmatpush1.bf16.msra.mxu0 %v2347_v14 }
  0x50   :  { %1643 = vmatprep.subr.bf16.mxu0 %v2350_v17 }
  0x51   :  { %1673 = vmatpush1.bf16.msra.mxu1 %v2366_v37 }
  0x52   :  { %1675 = vmatprep.subr.bf16.mxu1 %v2372_v45 }
  0x53   :  { %1645 = vmatpush1.bf16.msra.mxu0 %v2357_v26 }
  0x54   :  { %1647 = vmatprep.subr.bf16.mxu0 %v2361_v30 }
  0x55   :  { %1677 = vmatpush1.bf16.msra.mxu1 %v2378_v48 }
  0x56   :  { %1679 = vmatprep.subr.bf16.mxu1 %v2381_v52 }
  0x57   :  { %1649 = vmatpush1.bf16.msra.mxu0 %v2370_v42 }
  0x58   :  { %1651 = vmatprep.subr.bf16.mxu0 %v2375_v46 }
  0x59   :  { %1681 = vmatpush1.bf16.msra.mxu1 %v2390_v62 }
  0x5a   :  { %1683 = vmatprep.subr.bf16.mxu1 %v2393_v1 }
  0x5b   :  { %1653 = vmatpush1.bf16.msra.mxu0 %v2384_v55 }
  0x5c   :  { %1655 = vmatprep.subr.bf16.mxu0 %v2387_v58 }
  0x5d   :  { %1685 = vmatpush1.bf16.msra.mxu1 %v2402_v15 }
  0x5e   :  { %1687 = vmatprep.subr.bf16.mxu1 %v2405_v18 }
  0x5f   :  { %1657 = vmatpush1.bf16.msra.mxu0 %v2396_v7 }
  0x60   :  { %1659 = vmatprep.subr.bf16.mxu0 %v2399_v10 }
  0x61   :  { %1689 = vmatpush1.bf16.msra.mxu1 %v2414_v31 }
  0x62   :  { %1691 = vmatprep.subr.bf16.mxu1 %v2417_v32 }
  0x63   :  { %1661 = vmatpush1.bf16.msra.mxu0 %v2408_v24 }
  0x64   :  { %1663 = vmatprep.subr.bf16.mxu0 %v2411_v27 }
  0x65   :  { %1693 = vmatpush1.bf16.msra.mxu1 %v2424_v40 }
  0x66   :  { %1695 = vmatprep.subr.bf16.mxu1 %v2427_v41 }
  0x67   :  { %1665 = vmatpush1.bf16.msra.mxu0 %v2420_v39 }
  0x68   :  { %1699 = vmatprep.subr.bf16.mxu0 %v2339_v4 }
  0x69   :  { %1697 = vmatpush1.bf16.msra.mxu1 %v2431_v47 }
  0x6a   :  { %1731 = vmatprep.subr.bf16.mxu1 %v2352_v22 }
 0x11d   :  { %v182_v51 = vpop.f32.mrb[0].mxu0 }
 0x11e   :  { %v258_v53 = vadd.f32 %v182_v51, %v112_v49  ;;  %v184_v54 = vpop.f32.mrb[1].mxu0  ;;  %v289_v49 = vld [vmem:[#allocation4 + $0x28] sm:$0xff] }
 0x11f   :  { %v259_v56 = vadd.f32 %v184_v54, %v113_v50  ;;  %v253_v61 = vpop.f32.mrb[0].mxu1 }
 0x120   :  { %v1546_v57 = vmul.f32 -1.442695, %v258_v53  ;;  %v255_v63 = vpop.f32.mrb[1].mxu1  ;;  %v260_v6 = vadd.f32 %v253_v61, %v114_v3  ;;  %v291_v61 = vld [vmem:[#allocation4 + $0x38] sm:$0xff] }
 0x121   :  { %v1547_v59 = vmul.f32 -1.442695, %v259_v56  ;;  %v261_v2 = vadd.f32 %v255_v63, %v115_v60 }
 0x122   :  { %2090 = vpow2.f32 %v1546_v57 }
 0x123   :  { %2092 = vpow2.f32 %v1547_v59  ;;  %v1548_v5 = vmul.f32 -1.442695, %v261_v2  ;;  %v290_v2 = vld [vmem:[#allocation4 + $0x30] sm:$0xff] }
 0x125   :  { %2094 = vpow2.f32 %v1548_v5 }
 0x126   :  { %2096 = vtanh.f32 %v260_v6 }
 0x12c   :  { %v2091_v11 = vpop.eup %2090 }
 0x12d   :  { %v2093_v12 = vpop.eup %2092  ;;  %v265_v13 = vadd.f32 1.0, %v2091_v11 }
 0x12e   :  { %v271_v16 = vadd.f32 1.0, %v2093_v12 }
 0x12f   :  { %2098 = vrcp.f32 %v265_v13  ;;  %v2095_v19 = vpop.eup %2094 }
 0x130   :  { %2100 = vrcp.f32 %v271_v16  ;;  %v2097_v20 = vpop.eup %2096  ;;  %v278_v23 = vadd.f32 1.0, %v2095_v19 }
 0x132   :  { %2102 = vrcp.f32 %v278_v23 }
 0x139   :  { %v2099_v21 = vpop.eup %2098 }
 0x13a   :  { %v2101_v28 = vpop.eup %2100  ;;  %v282_v29 = vmul.f32 %v2099_v21, %v2097_v20 }
 0x13b   :  { %v281_v34 = vmul.f32 0.0, %v2101_v28 }
 0x13c   :  { %v2103_v36 = vpop.eup %2102 }
 0x13d   :  { %v2473_v35 = vadd.f32 %v282_v29, %v281_v34 }
 0x13f   :  { %2104 = vtanh.f32 %v2473_v35 }
 0x149   :  { %v2105_v38 = vpop.eup %2104 }
 0x14a   :  { %v285_v43 = vmul.f32 %v2105_v38, %v2103_v36 }
 0x14c   :  { %286 = vst [vmem:[#allocation9] sm:$0xff] %v285_v43  ;;  %357 = vmatmul.mubr.f32.vlgmr.msra.gmra.mrb[2].mxu0 %v285_v43  ;;  %428 = vmatmul.mubr.f32.vlgmr.msra.gmra.mrb[2].mxu1 %v285_v43 }
 0x14d   :  { %1701 = vmatpush1.bf16.msra.mxu0 %v2341_v8  ;;  %1733 = vmatpush1.bf16.msra.mxu1 %v2354_v25 }
 0x14e   :  { %1703 = vmatprep.subr.bf16.mxu0 %v2343_v9  ;;  %1735 = vmatprep.subr.bf16.mxu1 %v2364_v33 }
 0x14f   :  { %533 = vmatprep.mubr.f32.mxu0 %v2294_v0  ;;  %604 = vmatprep.mubr.f32.mxu1 %v2294_v0 }
 0x151   :  { %1705 = vmatpush1.bf16.msra.mxu0 %v2347_v14  ;;  %1737 = vmatpush1.bf16.msra.mxu1 %v2366_v37 }
 0x152   :  { %1707 = vmatprep.subr.bf16.mxu0 %v2350_v17  ;;  %1739 = vmatprep.subr.bf16.mxu1 %v2372_v45 }
 0x155   :  { %1709 = vmatpush1.bf16.msra.mxu0 %v2357_v26  ;;  %1741 = vmatpush1.bf16.msra.mxu1 %v2378_v48 }
 0x156   :  { %1711 = vmatprep.subr.bf16.mxu0 %v2361_v30  ;;  %1743 = vmatprep.subr.bf16.mxu1 %v2381_v52 }
 0x159   :  { %1713 = vmatpush1.bf16.msra.mxu0 %v2370_v42  ;;  %1745 = vmatpush1.bf16.msra.mxu1 %v2390_v62 }
 0x15a   :  { %1715 = vmatprep.subr.bf16.mxu0 %v2375_v46  ;;  %1747 = vmatprep.subr.bf16.mxu1 %v2393_v1 }
 0x15d   :  { %1717 = vmatpush1.bf16.msra.mxu0 %v2384_v55  ;;  %1749 = vmatpush1.bf16.msra.mxu1 %v2402_v15 }
 0x15e   :  { %1719 = vmatprep.subr.bf16.mxu0 %v2387_v58  ;;  %1751 = vmatprep.subr.bf16.mxu1 %v2405_v18 }
 0x161   :  { %1721 = vmatpush1.bf16.msra.mxu0 %v2396_v7  ;;  %1753 = vmatpush1.bf16.msra.mxu1 %v2414_v31 }
 0x162   :  { %1723 = vmatprep.subr.bf16.mxu0 %v2399_v10  ;;  %1755 = vmatprep.subr.bf16.mxu1 %v2417_v32 }
 0x165   :  { %1725 = vmatpush1.bf16.msra.mxu0 %v2408_v24  ;;  %1757 = vmatpush1.bf16.msra.mxu1 %v2424_v40 }
 0x166   :  { %1727 = vmatprep.subr.bf16.mxu0 %v2411_v27  ;;  %1759 = vmatprep.subr.bf16.mxu1 %v2427_v41 }
 0x169   :  { %1729 = vmatpush1.bf16.msra.mxu0 %v2420_v39  ;;  %1761 = vmatpush1.bf16.msra.mxu1 %v2431_v47 }
 0x16a   :  { %1763 = vmatprep.subr.bf16.mxu0 %v2339_v4  ;;  %1795 = vmatprep.subr.bf16.mxu1 %v2352_v22 }
 0x21f   :  { %v358_v50 = vpop.f32.mrb[2].mxu0  ;;  %v429_v51 = vpop.f32.mrb[2].mxu1 }
 0x220   :  { %v434_v53 = vadd.f32 %v358_v50, %v288_v44  ;;  %v360_v54 = vpop.f32.mrb[3].mxu0  ;;  %v431_v56 = vpop.f32.mrb[3].mxu1  ;;  %v436_v5 = vadd.f32 %v429_v51, %v290_v2  ;;  %v466_v44 = vld [vmem:[#allocation4 + $0x48] sm:$0xff] }
 0x221   :  { %v435_v57 = vadd.f32 %v360_v54, %v289_v49  ;;  %v437_v63 = vadd.f32 %v431_v56, %v291_v61 }
 0x222   :  { %v1549_v59 = vmul.f32 -1.442695, %v434_v53 }
 0x223   :  { %v1550_v60 = vmul.f32 -1.442695, %v435_v57  ;;  %v1551_v3 = vmul.f32 -1.442695, %v437_v63  ;;  %v467_v63 = vld [vmem:[#allocation4 + $0x50] sm:$0xff] }
 0x224   :  { %2106 = vpow2.f32 %v1549_v59 }
 0x225   :  { %2108 = vpow2.f32 %v1550_v60  ;;  %v468_v60 = vld [vmem:[#allocation4 + $0x58] sm:$0xff] }
 0x226   :  { %2110 = vpow2.f32 %v1551_v3 }
 0x227   :  { %2112 = vtanh.f32 %v436_v5 }
 0x22e   :  { %v2107_v6 = vpop.eup %2106 }
 0x22f   :  { %v2109_v11 = vpop.eup %2108  ;;  %v441_v12 = vadd.f32 1.0, %v2107_v6 }
 0x230   :  { %v447_v13 = vadd.f32 1.0, %v2109_v11  ;;  %v2111_v16 = vpop.eup %2110 }
 0x231   :  { %2114 = vrcp.f32 %v441_v12  ;;  %v2113_v19 = vpop.eup %2112  ;;  %v454_v28 = vadd.f32 1.0, %v2111_v16 }
 0x232   :  { %2116 = vrcp.f32 %v447_v13 }
 0x233   :  { %2118 = vrcp.f32 %v454_v28 }
 0x23b   :  { %v2115_v20 = vpop.eup %2114 }
 0x23c   :  { %v2117_v21 = vpop.eup %2116  ;;  %v458_v23 = vmul.f32 %v2115_v20, %v2113_v19 }
 0x23d   :  { %v457_v29 = vmul.f32 %v2117_v21, %v2473_v35  ;;  %v2119_v36 = vpop.eup %2118  ;;  %v465_v35 = vld [vmem:[#allocation4 + $0x40] sm:$0xff] }
 0x23f   :  { %v2511_v34 = vadd.f32 %v458_v23, %v457_v29 }
 0x241   :  { %2120 = vtanh.f32 %v2511_v34 }
 0x24b   :  { %v2121_v38 = vpop.eup %2120 }
 0x24c   :  { %v461_v43 = vmul.f32 %v2121_v38, %v2119_v36 }
 0x24e   :  { %463 = vst [vmem:[#allocation9 + $0x8] sm:$0xff] %v461_v43  ;;  %534 = vmatmul.mubr.f32.vlgmr.msra.gmra.mrb[4].mxu0 %v461_v43  ;;  %605 = vmatmul.mubr.f32.vlgmr.msra.gmra.mrb[4].mxu1 %v461_v43 }
 0x24f   :  { %1765 = vmatpush1.bf16.msra.mxu0 %v2341_v8  ;;  %1797 = vmatpush1.bf16.msra.mxu1 %v2354_v25 }
 0x250   :  { %1767 = vmatprep.subr.bf16.mxu0 %v2343_v9  ;;  %1799 = vmatprep.subr.bf16.mxu1 %v2364_v33 }
 0x251   :  { %710 = vmatprep.mubr.f32.mxu0 %v2294_v0  ;;  %781 = vmatprep.mubr.f32.mxu1 %v2294_v0 }
 0x253   :  { %1769 = vmatpush1.bf16.msra.mxu0 %v2347_v14  ;;  %1801 = vmatpush1.bf16.msra.mxu1 %v2366_v37 }
 0x254   :  { %1771 = vmatprep.subr.bf16.mxu0 %v2350_v17  ;;  %1803 = vmatprep.subr.bf16.mxu1 %v2372_v45 }
 0x257   :  { %1773 = vmatpush1.bf16.msra.mxu0 %v2357_v26  ;;  %1805 = vmatpush1.bf16.msra.mxu1 %v2378_v48 }
 0x258   :  { %1775 = vmatprep.subr.bf16.mxu0 %v2361_v30  ;;  %1807 = vmatprep.subr.bf16.mxu1 %v2381_v52 }
 0x25b   :  { %1777 = vmatpush1.bf16.msra.mxu0 %v2370_v42  ;;  %1809 = vmatpush1.bf16.msra.mxu1 %v2390_v62 }
 0x25c   :  { %1779 = vmatprep.subr.bf16.mxu0 %v2375_v46  ;;  %1811 = vmatprep.subr.bf16.mxu1 %v2393_v1 }
 0x25f   :  { %1781 = vmatpush1.bf16.msra.mxu0 %v2384_v55  ;;  %1813 = vmatpush1.bf16.msra.mxu1 %v2402_v15 }
 0x260   :  { %1783 = vmatprep.subr.bf16.mxu0 %v2387_v58  ;;  %1815 = vmatprep.subr.bf16.mxu1 %v2405_v18 }
 0x263   :  { %1785 = vmatpush1.bf16.msra.mxu0 %v2396_v7  ;;  %1817 = vmatpush1.bf16.msra.mxu1 %v2414_v31 }
 0x264   :  { %1787 = vmatprep.subr.bf16.mxu0 %v2399_v10  ;;  %1819 = vmatprep.subr.bf16.mxu1 %v2417_v32 }
 0x267   :  { %1789 = vmatpush1.bf16.msra.mxu0 %v2408_v24  ;;  %1821 = vmatpush1.bf16.msra.mxu1 %v2424_v40 }
 0x268   :  { %1791 = vmatprep.subr.bf16.mxu0 %v2411_v27  ;;  %1823 = vmatprep.subr.bf16.mxu1 %v2427_v41 }
 0x26b   :  { %1793 = vmatpush1.bf16.msra.mxu0 %v2420_v39  ;;  %1825 = vmatpush1.bf16.msra.mxu1 %v2431_v47 }
 0x26c   :  { %1827 = vmatprep.subr.bf16.mxu0 %v2339_v4  ;;  %1859 = vmatprep.subr.bf16.mxu1 %v2352_v22 }
 0x321   :  { %v535_v49 = vpop.f32.mrb[4].mxu0  ;;  %v606_v50 = vpop.f32.mrb[4].mxu1 }
 0x322   :  { %v611_v51 = vadd.f32 %v535_v49, %v465_v35  ;;  %v537_v53 = vpop.f32.mrb[5].mxu0  ;;  %v608_v54 = vpop.f32.mrb[5].mxu1  ;;  %v613_v3 = vadd.f32 %v606_v50, %v467_v63  ;;  %v643_v35 = vld [vmem:[#allocation4 + $0x68] sm:$0xff] }
 0x323   :  { %v612_v56 = vadd.f32 %v537_v53, %v466_v44  ;;  %v614_v61 = vadd.f32 %v608_v54, %v468_v60 }
 0x324   :  { %v1552_v57 = vmul.f32 -1.442695, %v611_v51 }
 0x325   :  { %v1553_v59 = vmul.f32 -1.442695, %v612_v56  ;;  %v1554_v2 = vmul.f32 -1.442695, %v614_v61  ;;  %v644_v61 = vld [vmem:[#allocation4 + $0x70] sm:$0xff] }
 0x326   :  { %2122 = vpow2.f32 %v1552_v57 }
 0x327   :  { %2124 = vpow2.f32 %v1553_v59  ;;  %v645_v59 = vld [vmem:[#allocation4 + $0x78] sm:$0xff] }
 0x328   :  { %2126 = vpow2.f32 %v1554_v2 }
 0x329   :  { %2128 = vtanh.f32 %v613_v3 }
 0x330   :  { %v2123_v5 = vpop.eup %2122 }
 0x331   :  { %v2125_v6 = vpop.eup %2124  ;;  %v618_v11 = vadd.f32 1.0, %v2123_v5 }
 0x332   :  { %v624_v12 = vadd.f32 1.0, %v2125_v6  ;;  %v2127_v13 = vpop.eup %2126 }
 0x333   :  { %2130 = vrcp.f32 %v618_v11  ;;  %v2129_v16 = vpop.eup %2128  ;;  %v631_v23 = vadd.f32 1.0, %v2127_v13 }
 0x334   :  { %2132 = vrcp.f32 %v624_v12 }
 0x335   :  { %2134 = vrcp.f32 %v631_v23 }
 0x33d   :  { %v2131_v19 = vpop.eup %2130 }
 0x33e   :  { %v2133_v20 = vpop.eup %2132  ;;  %v635_v21 = vmul.f32 %v2131_v19, %v2129_v16 }
 0x33f   :  { %v634_v28 = vmul.f32 %v2133_v20, %v2511_v34  ;;  %v2135_v36 = vpop.eup %2134  ;;  %v642_v34 = vld [vmem:[#allocation4 + $0x60] sm:$0xff] }
 0x341   :  { %v2549_v29 = vadd.f32 %v635_v21, %v634_v28 }
 0x343   :  { %2136 = vtanh.f32 %v2549_v29 }
 0x34d   :  { %v2137_v38 = vpop.eup %2136 }
 0x34e   :  { %v638_v43 = vmul.f32 %v2137_v38, %v2135_v36 }
 0x350   :  { %640 = vst [vmem:[#allocation9 + $0x10] sm:$0xff] %v638_v43  ;;  %711 = vmatmul.mubr.f32.vlgmr.msra.gmra.mrb[6].mxu0 %v638_v43  ;;  %782 = vmatmul.mubr.f32.vlgmr.msra.gmra.mrb[6].mxu1 %v638_v43 }
 0x351   :  { %1829 = vmatpush1.bf16.msra.mxu0 %v2341_v8  ;;  %1861 = vmatpush1.bf16.msra.mxu1 %v2354_v25 }
 0x352   :  { %1831 = vmatprep.subr.bf16.mxu0 %v2343_v9  ;;  %1863 = vmatprep.subr.bf16.mxu1 %v2364_v33 }
 0x353   :  { %887 = vmatprep.mubr.f32.mxu0 %v2294_v0  ;;  %958 = vmatprep.mubr.f32.mxu1 %v2294_v0 }
 0x355   :  { %1833 = vmatpush1.bf16.msra.mxu0 %v2347_v14  ;;  %1865 = vmatpush1.bf16.msra.mxu1 %v2366_v37 }
 0x356   :  { %1835 = vmatprep.subr.bf16.mxu0 %v2350_v17  ;;  %1867 = vmatprep.subr.bf16.mxu1 %v2372_v45 }
 0x359   :  { %1837 = vmatpush1.bf16.msra.mxu0 %v2357_v26  ;;  %1869 = vmatpush1.bf16.msra.mxu1 %v2378_v48 }
 0x35a   :  { %1839 = vmatprep.subr.bf16.mxu0 %v2361_v30  ;;  %1871 = vmatprep.subr.bf16.mxu1 %v2381_v52 }
 0x35d   :  { %1841 = vmatpush1.bf16.msra.mxu0 %v2370_v42  ;;  %1873 = vmatpush1.bf16.msra.mxu1 %v2390_v62 }
 0x35e   :  { %1843 = vmatprep.subr.bf16.mxu0 %v2375_v46  ;;  %1875 = vmatprep.subr.bf16.mxu1 %v2393_v1 }
 0x361   :  { %1845 = vmatpush1.bf16.msra.mxu0 %v2384_v55  ;;  %1877 = vmatpush1.bf16.msra.mxu1 %v2402_v15 }
 0x362   :  { %1847 = vmatprep.subr.bf16.mxu0 %v2387_v58  ;;  %1879 = vmatprep.subr.bf16.mxu1 %v2405_v18 }
 0x365   :  { %1849 = vmatpush1.bf16.msra.mxu0 %v2396_v7  ;;  %1881 = vmatpush1.bf16.msra.mxu1 %v2414_v31 }
 0x366   :  { %1851 = vmatprep.subr.bf16.mxu0 %v2399_v10  ;;  %1883 = vmatprep.subr.bf16.mxu1 %v2417_v32 }
 0x369   :  { %1853 = vmatpush1.bf16.msra.mxu0 %v2408_v24  ;;  %1885 = vmatpush1.bf16.msra.mxu1 %v2424_v40 }
 0x36a   :  { %1855 = vmatprep.subr.bf16.mxu0 %v2411_v27  ;;  %1887 = vmatprep.subr.bf16.mxu1 %v2427_v41 }
 0x36d   :  { %1857 = vmatpush1.bf16.msra.mxu0 %v2420_v39  ;;  %1889 = vmatpush1.bf16.msra.mxu1 %v2431_v47 }
 0x36e   :  { %1891 = vmatprep.subr.bf16.mxu0 %v2339_v4  ;;  %1923 = vmatprep.subr.bf16.mxu1 %v2352_v22 }
 0x423   :  { %v712_v44 = vpop.f32.mrb[6].mxu0  ;;  %v783_v49 = vpop.f32.mrb[6].mxu1 }
 0x424   :  { %v788_v50 = vadd.f32 %v712_v44, %v642_v34  ;;  %v714_v51 = vpop.f32.mrb[7].mxu0  ;;  %v785_v53 = vpop.f32.mrb[7].mxu1  ;;  %v790_v2 = vadd.f32 %v783_v49, %v644_v61  ;;  %v820_v34 = vld [vmem:[#allocation4 + $0x88] sm:$0xff] }
 0x425   :  { %v789_v54 = vadd.f32 %v714_v51, %v643_v35  ;;  %v791_v60 = vadd.f32 %v785_v53, %v645_v59 }
 0x426   :  { %v1555_v56 = vmul.f32 -1.442695, %v788_v50 }
 0x427   :  { %v1556_v57 = vmul.f32 -1.442695, %v789_v54  ;;  %v1557_v63 = vmul.f32 -1.442695, %v791_v60  ;;  %v821_v60 = vld [vmem:[#allocation4 + $0x90] sm:$0xff] }
 0x428   :  { %2138 = vpow2.f32 %v1555_v56 }
 0x429   :  { %2140 = vpow2.f32 %v1556_v57  ;;  %v822_v57 = vld [vmem:[#allocation4 + $0x98] sm:$0xff] }
 0x42a   :  { %2142 = vpow2.f32 %v1557_v63 }
 0x42b   :  { %2144 = vtanh.f32 %v790_v2 }
 0x432   :  { %v2139_v3 = vpop.eup %2138 }
 0x433   :  { %v2141_v5 = vpop.eup %2140  ;;  %v795_v6 = vadd.f32 1.0, %v2139_v3 }
 0x434   :  { %v801_v11 = vadd.f32 1.0, %v2141_v5  ;;  %v2143_v12 = vpop.eup %2142 }
 0x435   :  { %2146 = vrcp.f32 %v795_v6  ;;  %v2145_v13 = vpop.eup %2144  ;;  %v808_v21 = vadd.f32 1.0, %v2143_v12 }
 0x436   :  { %2148 = vrcp.f32 %v801_v11 }
 0x437   :  { %2150 = vrcp.f32 %v808_v21 }
 0x43f   :  { %v2147_v16 = vpop.eup %2146 }
 0x440   :  { %v2149_v19 = vpop.eup %2148  ;;  %v812_v20 = vmul.f32 %v2147_v16, %v2145_v13 }
 0x441   :  { %v811_v23 = vmul.f32 %v2149_v19, %v2549_v29  ;;  %v2151_v36 = vpop.eup %2150  ;;  %v819_v29 = vld [vmem:[#allocation4 + $0x80] sm:$0xff] }
 0x443   :  { %v2587_v28 = vadd.f32 %v812_v20, %v811_v23 }
 0x445   :  { %2152 = vtanh.f32 %v2587_v28 }
 0x44f   :  { %v2153_v38 = vpop.eup %2152 }
 0x450   :  { %v815_v43 = vmul.f32 %v2153_v38, %v2151_v36 }
 0x452   :  { %817 = vst [vmem:[#allocation9 + $0x18] sm:$0xff] %v815_v43  ;;  %888 = vmatmul.mubr.f32.vlgmr.msra.gmra.mrb[8].mxu0 %v815_v43  ;;  %959 = vmatmul.mubr.f32.vlgmr.msra.gmra.mrb[8].mxu1 %v815_v43 }
 0x453   :  { %1893 = vmatpush1.bf16.msra.mxu0 %v2341_v8  ;;  %1925 = vmatpush1.bf16.msra.mxu1 %v2354_v25 }
 0x454   :  { %1895 = vmatprep.subr.bf16.mxu0 %v2343_v9  ;;  %1927 = vmatprep.subr.bf16.mxu1 %v2364_v33 }
 0x455   :  { %1064 = vmatprep.mubr.f32.mxu0 %v2294_v0  ;;  %1135 = vmatprep.mubr.f32.mxu1 %v2294_v0 }
 0x457   :  { %1897 = vmatpush1.bf16.msra.mxu0 %v2347_v14  ;;  %1929 = vmatpush1.bf16.msra.mxu1 %v2366_v37 }
 0x458   :  { %1899 = vmatprep.subr.bf16.mxu0 %v2350_v17  ;;  %1931 = vmatprep.subr.bf16.mxu1 %v2372_v45 }
 0x45b   :  { %1901 = vmatpush1.bf16.msra.mxu0 %v2357_v26  ;;  %1933 = vmatpush1.bf16.msra.mxu1 %v2378_v48 }
 0x45c   :  { %1903 = vmatprep.subr.bf16.mxu0 %v2361_v30  ;;  %1935 = vmatprep.subr.bf16.mxu1 %v2381_v52 }
 0x45f   :  { %1905 = vmatpush1.bf16.msra.mxu0 %v2370_v42  ;;  %1937 = vmatpush1.bf16.msra.mxu1 %v2390_v62 }
 0x460   :  { %1907 = vmatprep.subr.bf16.mxu0 %v2375_v46  ;;  %1939 = vmatprep.subr.bf16.mxu1 %v2393_v1 }
 0x463   :  { %1909 = vmatpush1.bf16.msra.mxu0 %v2384_v55  ;;  %1941 = vmatpush1.bf16.msra.mxu1 %v2402_v15 }
 0x464   :  { %1911 = vmatprep.subr.bf16.mxu0 %v2387_v58  ;;  %1943 = vmatprep.subr.bf16.mxu1 %v2405_v18 }
 0x467   :  { %1913 = vmatpush1.bf16.msra.mxu0 %v2396_v7  ;;  %1945 = vmatpush1.bf16.msra.mxu1 %v2414_v31 }
 0x468   :  { %1915 = vmatprep.subr.bf16.mxu0 %v2399_v10  ;;  %1947 = vmatprep.subr.bf16.mxu1 %v2417_v32 }
 0x46b   :  { %1917 = vmatpush1.bf16.msra.mxu0 %v2408_v24  ;;  %1949 = vmatpush1.bf16.msra.mxu1 %v2424_v40 }
 0x46c   :  { %1919 = vmatprep.subr.bf16.mxu0 %v2411_v27  ;;  %1951 = vmatprep.subr.bf16.mxu1 %v2427_v41 }
 0x46f   :  { %1921 = vmatpush1.bf16.msra.mxu0 %v2420_v39  ;;  %1953 = vmatpush1.bf16.msra.mxu1 %v2431_v47 }
 0x470   :  { %1955 = vmatprep.subr.bf16.mxu0 %v2339_v4  ;;  %1987 = vmatprep.subr.bf16.mxu1 %v2352_v22 }
 0x525   :  { %v889_v35 = vpop.f32.mrb[8].mxu0  ;;  %v960_v44 = vpop.f32.mrb[8].mxu1 }
 0x526   :  { %v965_v49 = vadd.f32 %v889_v35, %v819_v29  ;;  %v891_v50 = vpop.f32.mrb[9].mxu0  ;;  %v962_v51 = vpop.f32.mrb[9].mxu1  ;;  %v967_v63 = vadd.f32 %v960_v44, %v821_v60  ;;  %v997_v29 = vld [vmem:[#allocation4 + $0xa8] sm:$0xff] }
 0x527   :  { %v966_v53 = vadd.f32 %v891_v50, %v820_v34  ;;  %v968_v59 = vadd.f32 %v962_v51, %v822_v57 }
 0x528   :  { %v1558_v54 = vmul.f32 -1.442695, %v965_v49 }
 0x529   :  { %v1559_v56 = vmul.f32 -1.442695, %v966_v53  ;;  %v1560_v61 = vmul.f32 -1.442695, %v968_v59  ;;  %v998_v59 = vld [vmem:[#allocation4 + $0xb0] sm:$0xff] }
 0x52a   :  { %2154 = vpow2.f32 %v1558_v54 }
 0x52b   :  { %2156 = vpow2.f32 %v1559_v56  ;;  %v999_v56 = vld [vmem:[#allocation4 + $0xb8] sm:$0xff] }
 0x52c   :  { %2158 = vpow2.f32 %v1560_v61 }
 0x52d   :  { %2160 = vtanh.f32 %v967_v63 }
 0x534   :  { %v2155_v2 = vpop.eup %2154 }
 0x535   :  { %v2157_v3 = vpop.eup %2156  ;;  %v972_v5 = vadd.f32 1.0, %v2155_v2 }
 0x536   :  { %v978_v6 = vadd.f32 1.0, %v2157_v3  ;;  %v2159_v11 = vpop.eup %2158 }
 0x537   :  { %2162 = vrcp.f32 %v972_v5  ;;  %v2161_v12 = vpop.eup %2160  ;;  %v985_v20 = vadd.f32 1.0, %v2159_v11 }
 0x538   :  { %2164 = vrcp.f32 %v978_v6 }
 0x539   :  { %2166 = vrcp.f32 %v985_v20 }
 0x541   :  { %v2163_v13 = vpop.eup %2162 }
 0x542   :  { %v2165_v16 = vpop.eup %2164  ;;  %v989_v19 = vmul.f32 %v2163_v13, %v2161_v12 }
 0x543   :  { %v988_v21 = vmul.f32 %v2165_v16, %v2587_v28  ;;  %v2167_v36 = vpop.eup %2166  ;;  %v996_v28 = vld [vmem:[#allocation4 + $0xa0] sm:$0xff] }
 0x545   :  { %v2625_v23 = vadd.f32 %v989_v19, %v988_v21 }
 0x547   :  { %2168 = vtanh.f32 %v2625_v23 }
 0x551   :  { %v2169_v38 = vpop.eup %2168 }
 0x552   :  { %v992_v43 = vmul.f32 %v2169_v38, %v2167_v36 }
 0x554   :  { %994 = vst [vmem:[#allocation9 + $0x20] sm:$0xff] %v992_v43  ;;  %1065 = vmatmul.mubr.f32.vlgmr.msra.gmra.mrb[10].mxu0 %v992_v43  ;;  %1136 = vmatmul.mubr.f32.vlgmr.msra.gmra.mrb[10].mxu1 %v992_v43 }
 0x555   :  { %1957 = vmatpush1.bf16.msra.mxu0 %v2341_v8  ;;  %1989 = vmatpush1.bf16.msra.mxu1 %v2354_v25 }
 0x556   :  { %1959 = vmatprep.subr.bf16.mxu0 %v2343_v9  ;;  %1991 = vmatprep.subr.bf16.mxu1 %v2364_v33 }
 0x557   :  { %1241 = vmatprep.mubr.f32.mxu0 %v2294_v0  ;;  %1312 = vmatprep.mubr.f32.mxu1 %v2294_v0 }
 0x559   :  { %1961 = vmatpush1.bf16.msra.mxu0 %v2347_v14  ;;  %1993 = vmatpush1.bf16.msra.mxu1 %v2366_v37 }
 0x55a   :  { %1963 = vmatprep.subr.bf16.mxu0 %v2350_v17  ;;  %1995 = vmatprep.subr.bf16.mxu1 %v2372_v45 }
 0x55d   :  { %1965 = vmatpush1.bf16.msra.mxu0 %v2357_v26  ;;  %1997 = vmatpush1.bf16.msra.mxu1 %v2378_v48 }
 0x55e   :  { %1967 = vmatprep.subr.bf16.mxu0 %v2361_v30  ;;  %1999 = vmatprep.subr.bf16.mxu1 %v2381_v52 }
 0x561   :  { %1969 = vmatpush1.bf16.msra.mxu0 %v2370_v42  ;;  %2001 = vmatpush1.bf16.msra.mxu1 %v2390_v62 }
 0x562   :  { %1971 = vmatprep.subr.bf16.mxu0 %v2375_v46  ;;  %2003 = vmatprep.subr.bf16.mxu1 %v2393_v1 }
 0x565   :  { %1973 = vmatpush1.bf16.msra.mxu0 %v2384_v55  ;;  %2005 = vmatpush1.bf16.msra.mxu1 %v2402_v15 }
 0x566   :  { %1975 = vmatprep.subr.bf16.mxu0 %v2387_v58  ;;  %2007 = vmatprep.subr.bf16.mxu1 %v2405_v18 }
 0x569   :  { %1977 = vmatpush1.bf16.msra.mxu0 %v2396_v7  ;;  %2009 = vmatpush1.bf16.msra.mxu1 %v2414_v31 }
 0x56a   :  { %1979 = vmatprep.subr.bf16.mxu0 %v2399_v10  ;;  %2011 = vmatprep.subr.bf16.mxu1 %v2417_v32 }
 0x56d   :  { %1981 = vmatpush1.bf16.msra.mxu0 %v2408_v24  ;;  %2013 = vmatpush1.bf16.msra.mxu1 %v2424_v40 }
 0x56e   :  { %1983 = vmatprep.subr.bf16.mxu0 %v2411_v27  ;;  %2015 = vmatprep.subr.bf16.mxu1 %v2427_v41 }
 0x571   :  { %1985 = vmatpush1.bf16.msra.mxu0 %v2420_v39  ;;  %2017 = vmatpush1.bf16.msra.mxu1 %v2431_v47 }
 0x572   :  { %2019 = vmatprep.subr.bf16.mxu0 %v2339_v4  ;;  %2051 = vmatprep.subr.bf16.mxu1 %v2352_v22 }
 0x627   :  { %v1066_v34 = vpop.f32.mrb[10].mxu0  ;;  %v1137_v35 = vpop.f32.mrb[10].mxu1 }
 0x628   :  { %v1142_v44 = vadd.f32 %v1066_v34, %v996_v28  ;;  %v1068_v49 = vpop.f32.mrb[11].mxu0  ;;  %v1139_v50 = vpop.f32.mrb[11].mxu1  ;;  %v1144_v61 = vadd.f32 %v1137_v35, %v998_v59 }
 0x629   :  { %v1143_v51 = vadd.f32 %v1068_v49, %v997_v29  ;;  %v1145_v57 = vadd.f32 %v1139_v50, %v999_v56  ;;  %v1353_v50 = vld [vmem:[#allocation4 + $0xf8] sm:$0xff] }
 0x62a   :  { %v1561_v53 = vmul.f32 -1.442695, %v1142_v44 }
 0x62b   :  { %v1562_v54 = vmul.f32 -1.442695, %v1143_v51  ;;  %v1563_v60 = vmul.f32 -1.442695, %v1145_v57 }
 0x62c   :  { %2170 = vpow2.f32 %v1561_v53  ;;  %v1352_v53 = vld [vmem:[#allocation4 + $0xf0] sm:$0xff] }
 0x62d   :  { %2172 = vpow2.f32 %v1562_v54 }
 0x62e   :  { %2174 = vpow2.f32 %v1563_v60 }
 0x62f   :  { %2176 = vtanh.f32 %v1144_v61 }
 0x636   :  { %v2171_v4 = vpop.eup %2170 }
 0x637   :  { %v2173_v63 = vpop.eup %2172  ;;  %v1149_v22 = vadd.f32 1.0, %v2171_v4 }
 0x638   :  { %v1155_v2 = vadd.f32 1.0, %v2173_v63  ;;  %v2175_v3 = vpop.eup %2174 }
 0x639   :  { %2178 = vrcp.f32 %v1149_v22  ;;  %v2177_v5 = vpop.eup %2176  ;;  %v1162_v13 = vadd.f32 1.0, %v2175_v3 }
 0x63a   :  { %2180 = vrcp.f32 %v1155_v2 }
 0x63b   :  { %2182 = vrcp.f32 %v1162_v13 }
 0x643   :  { %v2179_v6 = vpop.eup %2178 }
 0x644   :  { %v2181_v11 = vpop.eup %2180  ;;  %v1166_v12 = vmul.f32 %v2179_v6, %v2177_v5 }
 0x645   :  { %v1165_v16 = vmul.f32 %v2181_v11, %v2625_v23  ;;  %v2183_v20 = vpop.eup %2182  ;;  %v1351_v23 = vld [vmem:[#allocation4 + $0xe8] sm:$0xff] }
 0x647   :  { %v2663_v19 = vadd.f32 %v1166_v12, %v1165_v16 }
 0x649   :  { %2184 = vtanh.f32 %v2663_v19 }
 0x653   :  { %v2185_v21 = vpop.eup %2184 }
 0x654   :  { %v1169_v36 = vmul.f32 %v2185_v21, %v2183_v20 }
 0x656   :  { %1171 = vst [vmem:[#allocation9 + $0x28] sm:$0xff] %v1169_v36  ;;  %1242 = vmatmul.mubr.f32.vlgmr.msra.gmra.mrb[12].mxu0 %v1169_v36  ;;  %1313 = vmatmul.mubr.f32.vlgmr.msra.gmra.mrb[12].mxu1 %v1169_v36 }
 0x657   :  { %2021 = vmatpush1.bf16.msra.mxu0 %v2341_v8  ;;  %2053 = vmatpush1.bf16.msra.mxu1 %v2354_v25  ;;  %v1174_v8 = vld [vmem:[#allocation4 + $0xc8] sm:$0xff] }
 0x658   :  { %2023 = vmatprep.subr.bf16.mxu0 %v2343_v9  ;;  %2055 = vmatprep.subr.bf16.mxu1 %v2364_v33 }
 0x659   :  { %1418 = vmatprep.mubr.f32.mxu0 %v2294_v0  ;;  %1489 = vmatprep.mubr.f32.mxu1 %v2294_v0  ;;  %v1173_v0 = vld [vmem:[#allocation4 + $0xc0] sm:$0xff] }
 0x65b   :  { %2025 = vmatpush1.bf16.msra.mxu0 %v2347_v14  ;;  %2057 = vmatpush1.bf16.msra.mxu1 %v2366_v37 }
 0x65c   :  { %2027 = vmatprep.subr.bf16.mxu0 %v2350_v17  ;;  %2059 = vmatprep.subr.bf16.mxu1 %v2372_v45 }
 0x65f   :  { %2029 = vmatpush1.bf16.msra.mxu0 %v2357_v26  ;;  %2061 = vmatpush1.bf16.msra.mxu1 %v2378_v48 }
 0x660   :  { %2031 = vmatprep.subr.bf16.mxu0 %v2361_v30  ;;  %2063 = vmatprep.subr.bf16.mxu1 %v2381_v52 }
 0x663   :  { %2033 = vmatpush1.bf16.msra.mxu0 %v2370_v42  ;;  %2065 = vmatpush1.bf16.msra.mxu1 %v2390_v62  ;;  %v1176_v42 = vld [vmem:[#allocation4 + $0xd8] sm:$0xff] }
 0x664   :  { %2035 = vmatprep.subr.bf16.mxu0 %v2375_v46  ;;  %2067 = vmatprep.subr.bf16.mxu1 %v2393_v1  ;;  %v1175_v46 = vld [vmem:[#allocation4 + $0xd0] sm:$0xff] }
 0x667   :  { %2037 = vmatpush1.bf16.msra.mxu0 %v2384_v55  ;;  %2069 = vmatpush1.bf16.msra.mxu1 %v2402_v15 }
 0x668   :  { %2039 = vmatprep.subr.bf16.mxu0 %v2387_v58  ;;  %2071 = vmatprep.subr.bf16.mxu1 %v2405_v18 }
 0x66b   :  { %2041 = vmatpush1.bf16.msra.mxu0 %v2396_v7  ;;  %2073 = vmatpush1.bf16.msra.mxu1 %v2414_v31 }
 0x66c   :  { %2043 = vmatprep.subr.bf16.mxu0 %v2399_v10  ;;  %2075 = vmatprep.subr.bf16.mxu1 %v2417_v32 }
 0x66f   :  { %2045 = vmatpush1.bf16.msra.mxu0 %v2408_v24  ;;  %2077 = vmatpush1.bf16.msra.mxu1 %v2424_v40 }
 0x670   :  { %2047 = vmatprep.subr.bf16.mxu0 %v2411_v27  ;;  %2079 = vmatprep.subr.bf16.mxu1 %v2427_v41 }
 0x673   :  { %2049 = vmatpush1.bf16.msra.mxu0 %v2420_v39  ;;  %2081 = vmatpush1.bf16.msra.mxu1 %v2431_v47  ;;  %v1350_v47 = vld [vmem:[#allocation4 + $0xe0] sm:$0xff] }
 0x729   :  { %v1243_v9 = vpop.f32.mrb[12].mxu0  ;;  %v1314_v14 = vpop.f32.mrb[12].mxu1 }
 0x72a   :  { %v1319_v17 = vadd.f32 %v1243_v9, %v1173_v0  ;;  %v1245_v25 = vpop.f32.mrb[13].mxu0  ;;  %v1316_v26 = vpop.f32.mrb[13].mxu1  ;;  %v1321_v52 = vadd.f32 %v1314_v14, %v1175_v46 }
 0x72b   :  { %v1320_v30 = vadd.f32 %v1245_v25, %v1174_v8  ;;  %v1322_v45 = vadd.f32 %v1316_v26, %v1176_v42 }
 0x72c   :  { %v1564_v33 = vmul.f32 -1.442695, %v1319_v17 }
 0x72d   :  { %v1565_v37 = vmul.f32 -1.442695, %v1320_v30  ;;  %v1566_v48 = vmul.f32 -1.442695, %v1322_v45 }
 0x72e   :  { %2186 = vpow2.f32 %v1564_v33 }
 0x72f   :  { %2188 = vpow2.f32 %v1565_v37 }
 0x730   :  { %2190 = vpow2.f32 %v1566_v48 }
 0x731   :  { %2192 = vtanh.f32 %v1321_v52 }
 0x738   :  { %v2187_v55 = vpop.eup %2186 }
 0x739   :  { %v2189_v58 = vpop.eup %2188  ;;  %v1326_v62 = vadd.f32 1.0, %v2187_v55 }
 0x73a   :  { %v1332_v1 = vadd.f32 1.0, %v2189_v58  ;;  %v2191_v7 = vpop.eup %2190 }
 0x73b   :  { %2194 = vrcp.f32 %v1326_v62  ;;  %v2193_v10 = vpop.eup %2192  ;;  %v1339_v27 = vadd.f32 1.0, %v2191_v7 }
 0x73c   :  { %2196 = vrcp.f32 %v1332_v1 }
 0x73d   :  { %2198 = vrcp.f32 %v1339_v27 }
 0x745   :  { %v2195_v15 = vpop.eup %2194 }
 0x746   :  { %v2197_v18 = vpop.eup %2196  ;;  %v1343_v24 = vmul.f32 %v2195_v15, %v2193_v10 }
 0x747   :  { %v1342_v31 = vmul.f32 %v2197_v18, %v2663_v19  ;;  %v2199_v39 = vpop.eup %2198 }
 0x749   :  { %v1344_v32 = vadd.f32 %v1343_v24, %v1342_v31 }
 0x74b   :  { %2200 = vtanh.f32 %v1344_v32 }
 0x755   :  { %v2201_v40 = vpop.eup %2200 }
 0x756   :  { %v1346_v41 = vmul.f32 %v2201_v40, %v2199_v39 }
 0x758   :  { %1348 = vst [vmem:[#allocation9 + $0x30] sm:$0xff] %v1346_v41  ;;  %1419 = vmatmul.mubr.f32.vlgmr.msra.gmra.mrb[14].mxu0 %v1346_v41  ;;  %1490 = vmatmul.mubr.f32.vlgmr.msra.gmra.mrb[14].mxu1 %v1346_v41 }
 0x82b   :  { %v1420_v38 = vpop.f32.mrb[14].mxu0  ;;  %v1491_v43 = vpop.f32.mrb[14].mxu1 }
 0x82c   :  { %v1496_v28 = vadd.f32 %v1420_v38, %v1350_v47  ;;  %v1422_v29 = vpop.f32.mrb[15].mxu0  ;;  %v1493_v34 = vpop.f32.mrb[15].mxu1  ;;  %v1498_v56 = vadd.f32 %v1491_v43, %v1352_v53 }
 0x82d   :  { %v1497_v35 = vadd.f32 %v1422_v29, %v1351_v23  ;;  %v1499_v51 = vadd.f32 %v1493_v34, %v1353_v50 }
 0x82e   :  { %v1567_v44 = vmul.f32 -1.442695, %v1496_v28 }
 0x82f   :  { %v1568_v49 = vmul.f32 -1.442695, %v1497_v35  ;;  %v1569_v54 = vmul.f32 -1.442695, %v1499_v51 }
 0x830   :  { %2202 = vpow2.f32 %v1567_v44 }
 0x831   :  { %2204 = vpow2.f32 %v1568_v49 }
 0x832   :  { %2206 = vpow2.f32 %v1569_v54 }
 0x833   :  { %2208 = vtanh.f32 %v1498_v56 }
 0x83a   :  { %v2203_v57 = vpop.eup %2202 }
 0x83b   :  { %v2205_v59 = vpop.eup %2204  ;;  %v1503_v60 = vadd.f32 1.0, %v2203_v57 }
 0x83c   :  { %v1509_v61 = vadd.f32 1.0, %v2205_v59  ;;  %v2207_v4 = vpop.eup %2206 }
 0x83d   :  { %2210 = vrcp.f32 %v1503_v60  ;;  %v2209_v63 = vpop.eup %2208  ;;  %v1516_v5 = vadd.f32 1.0, %v2207_v4 }
 0x83e   :  { %2212 = vrcp.f32 %v1509_v61 }
 0x83f   :  { %2214 = vrcp.f32 %v1516_v5 }
 0x847   :  { %v2211_v22 = vpop.eup %2210 }
 0x848   :  { %v2213_v2 = vpop.eup %2212  ;;  %v1520_v3 = vmul.f32 %v2211_v22, %v2209_v63 }
 0x849   :  { %v1519_v6 = vmul.f32 %v2213_v2, %v1344_v32  ;;  %v2215_v12 = vpop.eup %2214 }
 0x84b   :  { %v1521_v11 = vadd.f32 %v1520_v3, %v1519_v6 }
 0x84d   :  { %2216 = vtanh.f32 %v1521_v11 }
 0x857   :  { %v2217_v13 = vpop.eup %2216 }
 0x858   :  { %v1523_v16 = vmul.f32 %v2217_v13, %v2215_v12 }
 0x85a   :  { %1525 = vst [vmem:[#allocation9 + $0x38] sm:$0xff] %v1523_v16 }
 0x85b   :  { %2273 = shalt.err (!%p2270_p6)
}
 0x85c   :  { %s2274_s10 = scalar_lea.hbm %s2713_s2, 1024 }
 0x85d   :  { %p2275_p7 = scmp.ne.s32.totalorder %s2713_s2, %s2274_s10  ;;  %p2278_p8 = scmp.lt.u32.totalorder %s2274_s10, %s2713_s2 }
 0x85f   :  { %p2280_p9 = pnand %p2278_p8, %p2275_p7 }
 0x861   :  { %2283 = shalt.err (!%p2280_p9)
}
 0x862   :  { %s2296_s15 = smov 128   ;;  %s2297_s16 = smov 8  }
 0x863   :  { %1539 = dma.vmem_to_hbm [thread:$0]  %s1534_s6, 1024, %s2713_s2, [#allocation6], %s2296_s15, %s2296_s15, %s2297_s16  }
 0x864   :  { %2288 = dma.done.wait [#allocation6], 1024  }
 0x865   :  { %2289 = vsyncadd [#allocation6], 4294966272 }
 0x866   :  { %1543 = vsyncpa [#allocation5], 1 }
 0x867   :  { %1544 = vsyncpa [#allocation8], 1 }
 0x868   :  { %1545 = vsyncpa [#allocation6], 1 }

</bundles_post_ra>
